<compile_context>
chip_gen: v7x
topology: tpu7x:2x2x1
jax: 0.10.0
libtpu: 0.0.40
codegen_flags: <defaults>
</compile_context>

<pallas_src>
import numpy as np
import jax
import jax.numpy as jnp
from jax.experimental import pallas as pl
from jax.experimental.pallas import tpu as pltpu


def _round_up(v, m):
    return ((v + m - 1) // m) * m


def _pick_vmem_limit():
    """~75% of this generation's physical VMEM (64 MiB v7x, 128 MiB v5e/v6e), capped at 100 MiB."""
    cap = 64 * 1024 * 1024
    try:
        cap = int(getattr(pltpu.get_tpu_info(), "vmem_capacity_bytes", cap))
    except Exception:
        pass
    return int(min(cap * 3 // 4, 100 * 1024 * 1024))


def _logit_kernel(x_ref, eps_ref, xs_t_ref, xs_sq_ref, dsq_ref,
                  sab_ref, sigma_ref, inv2sig_ref, coef_ref,
                  out_ref,
                  xts_ref, xts_sq_ref, m_ref, l_ref, s_ref):
    """Grid point = (instance b, class c, T-tile t, per-class sample tile n).

    Online (m, L = sum e, S = sum e^2 * dsq) softmax over the class's samples; the exact
    identity sum_{j,d}(w_j * delta_{j,d})^2 == sum_j w_j^2 ||delta_j||^2 lets S/L^2 replace
    any materialized weight matrix.  Padded sample columns carry ||xs||^2 = 1e30 so their
    softmax weight is exactly 0; padded timesteps carry coef = 0.
    """
    t = pl.program_id(2)
    n = pl.program_id(3)

    @pl.when(jnp.logical_and(t == 0, n == 0))
    def _init_logit():
        out_ref[...] = jnp.zeros_like(out_ref)

    @pl.when(n == 0)
    def _start_t_tile():
        # Fused diffusion sampling: xts[t] = sqrt(ab[t]) * x + sigma[t] * eps[t].
        # eps may arrive as bf16 in HBM (halved DMA); upcast once here.
        xts = sab_ref[...] * x_ref[...] + sigma_ref[...] * eps_ref[...].astype(jnp.float32)
        xts_ref[...] = xts
        xts_sq_ref[...] = jnp.sum(xts * xts, axis=1, keepdims=True)
        m_ref[...] = jnp.full(m_ref.shape, -3.0e38, jnp.float32)
        l_ref[...] = jnp.zeros_like(l_ref)
        s_ref[...] = jnp.zeros_like(s_ref)

    sab = sab_ref[...]                                                        # (Tt, 1)
    xts = xts_ref[...]                                                        # (Tt, D)

    # dist[t,j] = ||xts[t] - sqrt(ab[t]) xs[j]||^2 via the MXU-friendly expansion.
    cross = jnp.dot(xts, xs_t_ref[...], preferred_element_type=jnp.float32)   # (Tt, Nn) MXU
    dist = xts_sq_ref[...] - (2.0 * sab) * cross + (sab * sab) * xs_sq_ref[...]
    logits = -dist * inv2sig_ref[...]                                         # (Tt, Nn)

    # Online masked-softmax statistics (exact rescale when the running max moves).
    m_old = m_ref[...]
    m_new = jnp.maximum(m_old, jnp.max(logits, axis=1, keepdims=True))
    a = jnp.exp(m_old - m_new)
    e = jnp.exp(logits - m_new)
    l_ref[...] = a * l_ref[...] + jnp.sum(e, axis=1, keepdims=True)
    s_ref[...] = (a * a) * s_ref[...] + jnp.sum((e * e) * dsq_ref[...], axis=1, keepdims=True)
    m_ref[...] = m_new

    @pl.when(n == pl.num_programs(3) - 1)
    def _finish_t_tile():
        inv_l = pl.reciprocal(l_ref[...], approx=False)     # exact: error would enter squared
        s = s_ref[...] * (inv_l * inv_l)                    # (Tt, 1)
        out_ref[...] += jnp.sum(s * coef_ref[...], axis=0, keepdims=True)


def optimal_diffusion_classifier_forward(x, xs_train, ys_train, beta, num_classes, eps,
                                         noise_dtype=None):
    """JAX/Pallas equivalent of OptimalDiffusionClassifier.forward.

    x:        (B, C, H, W)            query images (NCHW)
    xs_train: (N, C, H, W)            "loader" training images
    ys_train: (N,)                    integer labels in [0, num_classes)
    beta:     (T,)                    noise schedule
    eps:      (B, num_classes, T, D)  Gaussian noise (one draw per forward_one_logit call)
    noise_dtype: optional storage dtype for eps in HBM (e.g. jnp.bfloat16); kernel upcasts.
    returns:  (B, num_classes) logits

    Note: the per-class grouping is host-side, data-dependent preprocessing (mirrors the
    module's _init); call this function eagerly, do not wrap the whole thing in jax.jit.
    """
    B, C, H, W = x.shape
    D = C * H * W
    N = int(xs_train.shape[0])

    beta = jnp.asarray(beta, jnp.float32)
    alpha = 1.0 - beta
    alpha_bar = jnp.cumprod(alpha)
    sigma = jnp.sqrt(1.0 - alpha_bar)
    sqrt_ab = jnp.sqrt(alpha_bar)
    T = int(alpha_bar.shape[0])

    # ---- lane-friendly padding of the feature axis --------------------------------------
    Dp = max(128, _round_up(D, 128))
    x_flat = jnp.pad(x.reshape(B, D).astype(jnp.float32), ((0, 0), (0, Dp - D)))
    xs_flat = jnp.pad(xs_train.reshape(N, D).astype(jnp.float32), ((0, 0), (0, Dp - D)))

    # ---- per-class gather: sort by class host-side, pad every class to Npc rows ---------
    ys_np = np.asarray(ys_train).astype(np.int64).reshape(N)
    counts = np.bincount(ys_np, minlength=num_classes)[:num_classes]
    max_count = max(int(counts.max()), 1)

    # Per-class sample tile Nn: lane multiple of 128, sized so a double-buffered (Dp, Nn)
    # f32 xs slab stays within ~16 MiB (fits v7x's 64 MiB VMEM with everything else).
    nn_cap = max(128, ((16 * 1024 * 1024) // (2 * Dp * 4)) // 128 * 128)
    Nn = int(min(_round_up(max_count, 128), nn_cap))
    Npc = int(_round_up(max_count, Nn))
    NT = Npc // Nn

    order = np.argsort(ys_np, kind="stable").astype(np.int32)
    ys_sorted = ys_np[order]
    starts = np.concatenate([[0], np.cumsum(counts)[:-1]])
    dest = (ys_sorted * Npc + (np.arange(N) - starts[ys_sorted])).astype(np.int32)

    xs_bc = jnp.zeros((num_classes * Npc, Dp), jnp.float32)
    xs_bc = xs_bc.at[jnp.asarray(dest)].set(xs_flat[jnp.asarray(order)])
    xs_bc = xs_bc.reshape(num_classes, Npc, Dp)                          # pad rows are zero
    valid = jnp.asarray(np.arange(Npc)[None, :] < counts[:, None])      # (num_classes, Npc)

    xs_t = jnp.transpose(xs_bc, (0, 2, 1))                               # (num_classes, Dp, Npc)
    xs_sq_real = jnp.sum(xs_bc * xs_bc, axis=-1)                         # (num_classes, Npc)
    # Padded columns get a huge squared norm -> dist huge -> softmax weight exactly 0.
    xs_sq = jnp.where(valid, xs_sq_real, 1e30).reshape(num_classes, 1, Npc)

    # ||x_b - xs||^2 per (instance, class, class-sample); pad columns forced to 0.
    # TODO(synk): a class with zero training samples makes the softmax ill-defined, exactly
    # like the PyTorch reference; no guard is added (here it yields logit 0 instead of NaN).
    x_sq = jnp.sum(x_flat * x_flat, axis=1)                              # (B,)
    xdot = jnp.einsum('bd,cnd->bcn', x_flat, xs_bc)                      # (B, num_classes, Npc)
    dsq = jnp.maximum(x_sq[:, None, None] - 2.0 * xdot + xs_sq_real[None], 0.0)
    dsq = jnp.where(valid[None], dsq, 0.0).reshape(B, num_classes, 1, Npc)

    # ---- timestep tiling: MXU-row-friendly Tt; padded timesteps contribute exactly 0 ----
    Tt = 128 if T >= 128 else _round_up(T, 8)
    Tp = _round_up(T, Tt)
    TT = Tp // Tt

    def _pad_t(col, pad_value):
        pad = jnp.full((Tp - T,), pad_value, jnp.float32)
        return jnp.concatenate([col.astype(jnp.float32), pad]).reshape(Tp, 1)

    sab_col = _pad_t(sqrt_ab, 0.0)
    sigma_col = _pad_t(sigma, 1.0)
    inv2sig_col = _pad_t(1.0 / (2.0 * sigma), 0.5)
    coef_col = _pad_t(-(alpha_bar / (sigma * sigma)) / T, 0.0)           # sign & 1/T folded in

    # ---- noise: keep caller dtype (or bf16 when requested), upcast in-kernel ------------
    if noise_dtype is None:
        noise_dtype = jnp.float32
    eps = jnp.asarray(eps).reshape(B, num_classes, T, D).astype(noise_dtype)
    if Tp != T or Dp != D:
        eps = jnp.pad(eps, ((0, 0), (0, 0), (0, Tp - T), (0, Dp - D)))

    x3 = x_flat.reshape(B, 1, Dp)

    out = pl.pallas_call(
        _logit_kernel,
        out_shape=jax.ShapeDtypeStruct((B, num_classes, 1, 1), jnp.float32),
        grid_spec=pltpu.PrefetchScalarGridSpec(
            num_scalar_prefetch=0,
            grid=(B, num_classes, TT, NT),
            in_specs=[
                pl.BlockSpec((None, 1, Dp), lambda b, c, t, n: (b, 0, 0)),            # x_b
                pl.BlockSpec((None, None, Tt, Dp), lambda b, c, t, n: (b, c, t, 0)),  # eps tile
                pl.BlockSpec((None, Dp, Nn), lambda b, c, t, n: (c, 0, n)),           # class xs^T tile
                pl.BlockSpec((None, 1, Nn), lambda b, c, t, n: (c, 0, n)),            # ||xs||^2 (+pad mask)
                pl.BlockSpec((None, None, 1, Nn), lambda b, c, t, n: (b, c, 0, n)),   # ||x - xs||^2
                pl.BlockSpec((Tt, 1), lambda b, c, t, n: (t, 0)),                     # sqrt(alpha_bar)
                pl.BlockSpec((Tt, 1), lambda b, c, t, n: (t, 0)),                     # sigma
                pl.BlockSpec((Tt, 1), lambda b, c, t, n: (t, 0)),                     # 1/(2*sigma)
                pl.BlockSpec((Tt, 1), lambda b, c, t, n: (t, 0)),                     # -ab/sigma^2/T
            ],
            out_specs=pl.BlockSpec((None, None, 1, 1), lambda b, c, t, n: (b, c, 0, 0)),
            scratch_shapes=[
                pltpu.VMEM((Tt, Dp), jnp.float32),   # xts (reused across the class-sample loop)
                pltpu.VMEM((Tt, 1), jnp.float32),    # ||xts||^2
                pltpu.VMEM((Tt, 1), jnp.float32),    # running max m
                pltpu.VMEM((Tt, 1), jnp.float32),    # running L = sum e
                pltpu.VMEM((Tt, 1), jnp.float32),    # running S = sum e^2 * ||x - xs||^2
            ],
        ),
        compiler_params=pltpu.CompilerParams(
            dimension_semantics=("parallel", "parallel", "arbitrary", "arbitrary"),
            vmem_limit_bytes=_pick_vmem_limit(),
        ),
    )(x3, eps, xs_t, xs_sq, dsq, sab_col, sigma_col, inv2sig_col, coef_col)

    return out.reshape(B, num_classes)


def _reference_forward(x, xs_train, ys_train, beta, num_classes, eps):
    """Pure numpy transcription of the PyTorch module (same noise draws)."""
    x = np.asarray(x, np.float32)
    xs_all = np.asarray(xs_train, np.float32)
    ys = np.asarray(ys_train)
    beta = np.asarray(beta, np.float32)
    eps = np.asarray(eps, np.float32)

    B, C, H, W = x.shape
    alpha = 1.0 - beta
    alpha_bar = np.cumprod(alpha).astype(np.float32)
    sigma = np.sqrt(1.0 - alpha_bar).astype(np.float32)
    T = alpha_bar.shape[0]

    out = np.zeros((B, num_classes), np.float32)
    for b in range(B):
        xb = x[b:b + 1]
        for y in range(num_classes):
            xs = xs_all[ys == y]
            Ny = xs.shape[0]
            delta = xb - xs
            repeated_x = np.broadcast_to(xb, (T, C, H, W))
            e = eps[b, y].reshape(T, C, H, W)
            xts = (np.sqrt(alpha_bar).reshape(-1, 1, 1, 1) * repeated_x
                   + sigma.reshape(-1, 1, 1, 1) * e)
            si = xts[None] - np.sqrt(alpha_bar).reshape(1, -1, 1, 1, 1) * xs[:, None]
            si = np.sum(si.reshape(Ny, T, -1) ** 2, axis=2)
            z = -si / (2.0 * sigma.reshape(1, -1))
            z = z - z.max(axis=0, keepdims=True)
            sm = np.exp(z)
            sm = sm / sm.sum(axis=0, keepdims=True)
            sm = sm.T
            dl = delta.reshape(1, Ny, -1)
            inner = sm.reshape(T, Ny, 1) * dl
            inner = np.sum(inner.reshape(T, -1) ** 2, axis=1)
            out[b, y] = -np.mean(inner * alpha_bar / sigma ** 2)
    return out


if __name__ == "__main__":
    key = jax.random.PRNGKey(0)
    num_classes = 10
    per_class = 2
    B, C, H, W = 2, 4, 8, 8
    T = 32
    D = C * H * W

    k_x, k_train, k_noise = jax.random.split(key, 3)
    x = jax.random.normal(k_x, (B, C, H, W), dtype=jnp.float32)
    xs_train = jax.random.normal(k_train, (num_classes * per_class, C, H, W), dtype=jnp.float32)
    ys_train = jnp.tile(jnp.arange(num_classes, dtype=jnp.int32), per_class)   # 2 samples/class

    beta = jnp.linspace(0.1 / 1000, 20 / 1000, T, dtype=jnp.float32)

    # One fresh Gaussian draw per (instance, class) call, mirroring torch.randn_like.
    eps = jax.random.normal(k_noise, (B, num_classes, T, D), dtype=jnp.float32)

    out = optimal_diffusion_classifier_forward(x, xs_train, ys_train, beta, num_classes, eps)
    out = jax.block_until_ready(out)

    ref = _reference_forward(x, xs_train, ys_train, beta, num_classes, eps)

    assert out.shape == (B, num_classes), out.shape
    assert np.all(np.isfinite(np.asarray(out)))
    if not np.allclose(np.asarray(out), ref, rtol=2e-2, atol=1e-2):
        raise ValueError(f"mismatch vs reference:\n{np.asarray(out)}\nvs\n{ref}")

    # Optional bandwidth-saving path: bf16 noise in HBM, upcast in-kernel (not bit-exact
    # with the f32 reference draws, so only checked for sanity here).
    out_bf16 = optimal_diffusion_classifier_forward(
        x, xs_train, ys_train, beta, num_classes, eps, noise_dtype=jnp.bfloat16)
    out_bf16 = jax.block_until_ready(out_bf16)
    assert out_bf16.shape == (B, num_classes)
    assert np.all(np.isfinite(np.asarray(out_bf16)))

    print("KERNEL_OK")
</pallas_src>

<mosaic_0001>
module attributes {stable_mosaic.version = 11 : i64} {
  func.func @_logit_kernel(%arg0: i32, %arg1: i32, %arg2: i32, %arg3: i32, %arg4: memref<1x1x256xf32, #tpu.memory_space<vmem>>, %arg5: memref<1x1x32x256xf32, #tpu.memory_space<vmem>>, %arg6: memref<1x256x128xf32, #tpu.memory_space<vmem>>, %arg7: memref<1x1x128xf32, #tpu.memory_space<vmem>>, %arg8: memref<1x1x1x128xf32, #tpu.memory_space<vmem>>, %arg9: memref<32x1xf32, #tpu.memory_space<vmem>>, %arg10: memref<32x1xf32, #tpu.memory_space<vmem>>, %arg11: memref<32x1xf32, #tpu.memory_space<vmem>>, %arg12: memref<32x1xf32, #tpu.memory_space<vmem>>, %arg13: memref<1x1x1x1xf32, #tpu.memory_space<vmem>>, %arg14: memref<32x256xf32, #tpu.memory_space<vmem>>, %arg15: memref<32x1xf32, #tpu.memory_space<vmem>>, %arg16: memref<32x1xf32, #tpu.memory_space<vmem>>, %arg17: memref<32x1xf32, #tpu.memory_space<vmem>>, %arg18: memref<32x1xf32, #tpu.memory_space<vmem>>) attributes {dimension_semantics = [#tpu.dimension_semantics<parallel>, #tpu.dimension_semantics<parallel>, #tpu.dimension_semantics<arbitrary>, #tpu.dimension_semantics<arbitrary>], iteration_bounds = array<i64: 2, 10, 1, 1>, scalar_prefetch = 0 : i64, scratch_operands = 5 : i64, tpu.core_type = #tpu.core_type<tc>, window_params = [{transform_indices = @transform_0, window_bounds = array<i64: 1, 1, 256>}, {transform_indices = @transform_1, window_bounds = array<i64: 1, 1, 32, 256>}, {transform_indices = @transform_2, window_bounds = array<i64: 1, 256, 128>}, {transform_indices = @transform_3, window_bounds = array<i64: 1, 1, 128>}, {transform_indices = @transform_4, window_bounds = array<i64: 1, 1, 1, 128>}, {transform_indices = @transform_5, window_bounds = array<i64: 32, 1>}, {transform_indices = @transform_6, window_bounds = array<i64: 32, 1>}, {transform_indices = @transform_7, window_bounds = array<i64: 32, 1>}, {transform_indices = @transform_8, window_bounds = array<i64: 32, 1>}, {transform_indices = @transform_9, window_bounds = array<i64: 1, 1, 1, 1>}]} {
    %c0_i32 = arith.constant 0 : i32
    %0 = arith.cmpi eq, %arg2, %c0_i32 : i32
    %c0_i32_0 = arith.constant 0 : i32
    %1 = arith.cmpi eq, %arg3, %c0_i32_0 : i32
    %2 = arith.andi %0, %1 : i1
    %3 = arith.extui %2 : i1 to i32
    %c0_i32_1 = arith.constant 0 : i32
    %4 = arith.cmpi ne, %3, %c0_i32_1 : i32
    scf.if %4 {
      %cst_40 = arith.constant 0.000000e+00 : f32
      %63 = vector.broadcast %cst_40 : f32 to vector<1x1xf32>
      %c0_41 = arith.constant 0 : index
      %c0_42 = arith.constant 0 : index
      %c0_43 = arith.constant 0 : index
      %c0_44 = arith.constant 0 : index
      %64 = vector.load %arg13[%c0_41, %c0_42, %c0_43, %c0_44] : memref<1x1x1x1xf32, #tpu.memory_space<vmem>>, vector<1x1x1x1xf32>
      %65 = vector.shape_cast %64 : vector<1x1x1x1xf32> to vector<1x1xf32>
      %66 = vector.shape_cast %63 : vector<1x1xf32> to vector<1x1x1x1xf32>
      tpu.vector_store %arg13[%c0_41, %c0_42, %c0_43, %c0_44], %66 {strides = array<i32>} : memref<1x1x1x1xf32, #tpu.memory_space<vmem>>, vector<1x1x1x1xf32>,
    } else {
    }
    %c0_i32_2 = arith.constant 0 : i32
    %5 = arith.cmpi eq, %arg3, %c0_i32_2 : i32
    %6 = arith.extui %5 : i1 to i32
    %c0_i32_3 = arith.constant 0 : i32
    %7 = arith.cmpi ne, %6, %c0_i32_3 : i32
    scf.if %7 {
      %c0_40 = arith.constant 0 : index
      %c0_41 = arith.constant 0 : index
      %63 = vector.load %arg9[%c0_40, %c0_41] : memref<32x1xf32, #tpu.memory_space<vmem>>, vector<32x1xf32>
      %c0_42 = arith.constant 0 : index
      %c0_43 = arith.constant 0 : index
      %c0_44 = arith.constant 0 : index
      %64 = vector.load %arg4[%c0_42, %c0_43, %c0_44] : memref<1x1x256xf32, #tpu.memory_space<vmem>>, vector<1x1x256xf32>
      %65 = vector.shape_cast %64 : vector<1x1x256xf32> to vector<1x256xf32>
      %66 = vector.broadcast %63 : vector<32x1xf32> to vector<32x256xf32>
      %67 = vector.broadcast %65 : vector<1x256xf32> to vector<32x256xf32>
      %68 = arith.mulf %66, %67 : vector<32x256xf32>
      %c0_45 = arith.constant 0 : index
      %c0_46 = arith.constant 0 : index
      %69 = vector.load %arg10[%c0_45, %c0_46] : memref<32x1xf32, #tpu.memory_space<vmem>>, vector<32x1xf32>
      %c0_47 = arith.constant 0 : index
      %c0_48 = arith.constant 0 : index
      %c0_49 = arith.constant 0 : index
      %c0_50 = arith.constant 0 : index
      %70 = vector.load %arg5[%c0_47, %c0_48, %c0_49, %c0_50] : memref<1x1x32x256xf32, #tpu.memory_space<vmem>>, vector<1x1x32x256xf32>
      %71 = vector.shape_cast %70 : vector<1x1x32x256xf32> to vector<32x256xf32>
      %72 = vector.broadcast %69 : vector<32x1xf32> to vector<32x256xf32>
      %73 = arith.mulf %72, %71 : vector<32x256xf32>
      %74 = arith.addf %68, %73 : vector<32x256xf32>
      %c0_51 = arith.constant 0 : index
      %c0_52 = arith.constant 0 : index
      %75 = vector.load %arg14[%c0_51, %c0_52] : memref<32x256xf32, #tpu.memory_space<vmem>>, vector<32x256xf32>
      tpu.vector_store %arg14[%c0_51, %c0_52], %74 {strides = array<i32>} : memref<32x256xf32, #tpu.memory_space<vmem>>, vector<32x256xf32>,
      %76 = arith.mulf %74, %74 : vector<32x256xf32>
      %cst_53 = arith.constant dense<0.000000e+00> : vector<32xf32>
      %77 = vector.multi_reduction <add>, %76, %cst_53 [1] : vector<32x256xf32> to vector<32xf32>
      %78 = vector.shape_cast %77 : vector<32xf32> to vector<32x1xf32>
      %c0_54 = arith.constant 0 : index
      %c0_55 = arith.constant 0 : index
      %79 = vector.load %arg15[%c0_54, %c0_55] : memref<32x1xf32, #tpu.memory_space<vmem>>, vector<32x1xf32>
      tpu.vector_store %arg15[%c0_54, %c0_55], %78 {strides = array<i32>} : memref<32x1xf32, #tpu.memory_space<vmem>>, vector<32x1xf32>,
      %cst_56 = arith.constant -3.000000e+38 : f32
      %80 = vector.broadcast %cst_56 : f32 to vector<32x1xf32>
      %c0_57 = arith.constant 0 : index
      %c0_58 = arith.constant 0 : index
      %81 = vector.load %arg16[%c0_57, %c0_58] : memref<32x1xf32, #tpu.memory_space<vmem>>, vector<32x1xf32>
      tpu.vector_store %arg16[%c0_57, %c0_58], %80 {strides = array<i32>} : memref<32x1xf32, #tpu.memory_space<vmem>>, vector<32x1xf32>,
      %cst_59 = arith.constant 0.000000e+00 : f32
      %82 = vector.broadcast %cst_59 : f32 to vector<32x1xf32>
      %c0_60 = arith.constant 0 : index
      %c0_61 = arith.constant 0 : index
      %83 = vector.load %arg17[%c0_60, %c0_61] : memref<32x1xf32, #tpu.memory_space<vmem>>, vector<32x1xf32>
      tpu.vector_store %arg17[%c0_60, %c0_61], %82 {strides = array<i32>} : memref<32x1xf32, #tpu.memory_space<vmem>>, vector<32x1xf32>,
      %cst_62 = arith.constant 0.000000e+00 : f32
      %84 = vector.broadcast %cst_62 : f32 to vector<32x1xf32>
      %c0_63 = arith.constant 0 : index
      %c0_64 = arith.constant 0 : index
      %85 = vector.load %arg18[%c0_63, %c0_64] : memref<32x1xf32, #tpu.memory_space<vmem>>, vector<32x1xf32>
      tpu.vector_store %arg18[%c0_63, %c0_64], %84 {strides = array<i32>} : memref<32x1xf32, #tpu.memory_space<vmem>>, vector<32x1xf32>,
    } else {
    }
    %c0 = arith.constant 0 : index
    %c0_4 = arith.constant 0 : index
    %8 = vector.load %arg9[%c0, %c0_4] : memref<32x1xf32, #tpu.memory_space<vmem>>, vector<32x1xf32>
    %c0_5 = arith.constant 0 : index
    %c0_6 = arith.constant 0 : index
    %9 = vector.load %arg14[%c0_5, %c0_6] : memref<32x256xf32, #tpu.memory_space<vmem>>, vector<32x256xf32>
    %c0_7 = arith.constant 0 : index
    %c0_8 = arith.constant 0 : index
    %c0_9 = arith.constant 0 : index
    %10 = vector.load %arg6[%c0_7, %c0_8, %c0_9] : memref<1x256x128xf32, #tpu.memory_space<vmem>>, vector<1x256x128xf32>
    %11 = vector.shape_cast %10 : vector<1x256x128xf32> to vector<256x128xf32>
    %cst = arith.constant dense<0.000000e+00> : vector<32x128xf32>
    %12 = tpu.matmul %9, %11, %cst {dimension_numbers = #tpu.dot_dimension_numbers<[1], [0], [0], [1], [0, 0, 1, 1], [], []>} : vector<32x256xf32>, vector<256x128xf32>, vector<32x128xf32> -> vector<32x128xf32>
    %c0_10 = arith.constant 0 : index
    %c0_11 = arith.constant 0 : index
    %13 = vector.load %arg15[%c0_10, %c0_11] : memref<32x1xf32, #tpu.memory_space<vmem>>, vector<32x1xf32>
    %cst_12 = arith.constant 2.000000e+00 : f32
    %14 = vector.broadcast %cst_12 : f32 to vector<32x1xf32>
    %15 = arith.mulf %14, %8 : vector<32x1xf32>
    %16 = vector.broadcast %15 : vector<32x1xf32> to vector<32x128xf32>
    %17 = arith.mulf %16, %12 : vector<32x128xf32>
    %18 = vector.broadcast %13 : vector<32x1xf32> to vector<32x128xf32>
    %19 = arith.subf %18, %17 : vector<32x128xf32>
    %20 = arith.mulf %8, %8 : vector<32x1xf32>
    %c0_13 = arith.constant 0 : index
    %c0_14 = arith.constant 0 : index
    %c0_15 = arith.constant 0 : index
    %21 = vector.load %arg7[%c0_13, %c0_14, %c0_15] : memref<1x1x128xf32, #tpu.memory_space<vmem>>, vector<1x1x128xf32>
    %22 = vector.shape_cast %21 : vector<1x1x128xf32> to vector<1x128xf32>
    %23 = vector.broadcast %20 : vector<32x1xf32> to vector<32x128xf32>
    %24 = vector.broadcast %22 : vector<1x128xf32> to vector<32x128xf32>
    %25 = arith.mulf %23, %24 : vector<32x128xf32>
    %26 = arith.addf %19, %25 : vector<32x128xf32>
    %cst_16 = arith.constant 0.000000e+00 : f32
    %27 = vector.broadcast %cst_16 : f32 to vector<32x128xf32>
    %28 = arith.subf %27, %26 : vector<32x128xf32>
    %c0_17 = arith.constant 0 : index
    %c0_18 = arith.constant 0 : index
    %29 = vector.load %arg11[%c0_17, %c0_18] : memref<32x1xf32, #tpu.memory_space<vmem>>, vector<32x1xf32>
    %30 = vector.broadcast %29 : vector<32x1xf32> to vector<32x128xf32>
    %31 = arith.mulf %28, %30 : vector<32x128xf32>
    %c0_19 = arith.constant 0 : index
    %c0_20 = arith.constant 0 : index
    %32 = vector.load %arg16[%c0_19, %c0_20] : memref<32x1xf32, #tpu.memory_space<vmem>>, vector<32x1xf32>
    %cst_21 = arith.constant dense<0xFF800000> : vector<32xf32>
    %33 = vector.multi_reduction <maximumf>, %31, %cst_21 [1] : vector<32x128xf32> to vector<32xf32>
    %34 = vector.shape_cast %33 : vector<32xf32> to vector<32x1xf32>
    %35 = arith.maximumf %32, %34 : vector<32x1xf32>
    %36 = arith.subf %32, %35 : vector<32x1xf32>
    %37 = math.exp %36 : vector<32x1xf32>
    %38 = vector.broadcast %35 : vector<32x1xf32> to vector<32x128xf32>
    %39 = arith.subf %31, %38 : vector<32x128xf32>
    %40 = math.exp %39 : vector<32x128xf32>
    %c0_22 = arith.constant 0 : index
    %c0_23 = arith.constant 0 : index
    %41 = vector.load %arg17[%c0_22, %c0_23] : memref<32x1xf32, #tpu.memory_space<vmem>>, vector<32x1xf32>
    %42 = arith.mulf %37, %41 : vector<32x1xf32>
    %cst_24 = arith.constant dense<0.000000e+00> : vector<32xf32>
    %43 = vector.multi_reduction <add>, %40, %cst_24 [1] : vector<32x128xf32> to vector<32xf32>
    %44 = vector.shape_cast %43 : vector<32xf32> to vector<32x1xf32>
    %45 = arith.addf %42, %44 : vector<32x1xf32>
    %c0_25 = arith.constant 0 : index
    %c0_26 = arith.constant 0 : index
    %46 = vector.load %arg17[%c0_25, %c0_26] : memref<32x1xf32, #tpu.memory_space<vmem>>, vector<32x1xf32>
    tpu.vector_store %arg17[%c0_25, %c0_26], %45 {strides = array<i32>} : memref<32x1xf32, #tpu.memory_space<vmem>>, vector<32x1xf32>,
    %47 = arith.mulf %37, %37 : vector<32x1xf32>
    %c0_27 = arith.constant 0 : index
    %c0_28 = arith.constant 0 : index
    %48 = vector.load %arg18[%c0_27, %c0_28] : memref<32x1xf32, #tpu.memory_space<vmem>>, vector<32x1xf32>
    %49 = arith.mulf %47, %48 : vector<32x1xf32>
    %50 = arith.mulf %40, %40 : vector<32x128xf32>
    %c0_29 = arith.constant 0 : index
    %c0_30 = arith.constant 0 : index
    %c0_31 = arith.constant 0 : index
    %c0_32 = arith.constant 0 : index
    %51 = vector.load %arg8[%c0_29, %c0_30, %c0_31, %c0_32] : memref<1x1x1x128xf32, #tpu.memory_space<vmem>>, vector<1x1x1x128xf32>
    %52 = vector.shape_cast %51 : vector<1x1x1x128xf32> to vector<1x128xf32>
    %53 = vector.broadcast %52 : vector<1x128xf32> to vector<32x128xf32>
    %54 = arith.mulf %50, %53 : vector<32x128xf32>
    %cst_33 = arith.constant dense<0.000000e+00> : vector<32xf32>
    %55 = vector.multi_reduction <add>, %54, %cst_33 [1] : vector<32x128xf32> to vector<32xf32>
    %56 = vector.shape_cast %55 : vector<32xf32> to vector<32x1xf32>
    %57 = arith.addf %49, %56 : vector<32x1xf32>
    %c0_34 = arith.constant 0 : index
    %c0_35 = arith.constant 0 : index
    %58 = vector.load %arg18[%c0_34, %c0_35] : memref<32x1xf32, #tpu.memory_space<vmem>>, vector<32x1xf32>
    tpu.vector_store %arg18[%c0_34, %c0_35], %57 {strides = array<i32>} : memref<32x1xf32, #tpu.memory_space<vmem>>, vector<32x1xf32>,
    %c0_36 = arith.constant 0 : index
    %c0_37 = arith.constant 0 : index
    %59 = vector.load %arg16[%c0_36, %c0_37] : memref<32x1xf32, #tpu.memory_space<vmem>>, vector<32x1xf32>
    tpu.vector_store %arg16[%c0_36, %c0_37], %35 {strides = array<i32>} : memref<32x1xf32, #tpu.memory_space<vmem>>, vector<32x1xf32>,
    %c0_i32_38 = arith.constant 0 : i32
    %60 = arith.cmpi eq, %arg3, %c0_i32_38 : i32
    %61 = arith.extui %60 : i1 to i32
    %c0_i32_39 = arith.constant 0 : i32
    %62 = arith.cmpi ne, %61, %c0_i32_39 : i32
    scf.if %62 {
      %c0_40 = arith.constant 0 : index
      %c0_41 = arith.constant 0 : index
      %63 = vector.load %arg17[%c0_40, %c0_41] : memref<32x1xf32, #tpu.memory_space<vmem>>, vector<32x1xf32>
      %64 = tpu.reciprocal %63 : vector<32x1xf32> -> vector<32x1xf32>
      %c0_42 = arith.constant 0 : index
      %c0_43 = arith.constant 0 : index
      %65 = vector.load %arg18[%c0_42, %c0_43] : memref<32x1xf32, #tpu.memory_space<vmem>>, vector<32x1xf32>
      %66 = arith.mulf %64, %64 : vector<32x1xf32>
      %67 = arith.mulf %65, %66 : vector<32x1xf32>
      %c0_44 = arith.constant 0 : index
      %c0_45 = arith.constant 0 : index
      %c0_46 = arith.constant 0 : index
      %c0_47 = arith.constant 0 : index
      %68 = vector.load %arg13[%c0_44, %c0_45, %c0_46, %c0_47] : memref<1x1x1x1xf32, #tpu.memory_space<vmem>>, vector<1x1x1x1xf32>
      %69 = vector.shape_cast %68 : vector<1x1x1x1xf32> to vector<1x1xf32>
      %c0_48 = arith.constant 0 : index
      %c0_49 = arith.constant 0 : index
      %70 = vector.load %arg12[%c0_48, %c0_49] : memref<32x1xf32, #tpu.memory_space<vmem>>, vector<32x1xf32>
      %71 = arith.mulf %67, %70 : vector<32x1xf32>
      %cst_50 = arith.constant dense<0.000000e+00> : vector<1xf32>
      %72 = vector.multi_reduction <add>, %71, %cst_50 [0] : vector<32x1xf32> to vector<1xf32>
      %73 = vector.shape_cast %72 : vector<1xf32> to vector<1x1xf32>
      %74 = arith.addf %69, %73 : vector<1x1xf32>
      %c0_51 = arith.constant 0 : index
      %c0_52 = arith.constant 0 : index
      %c0_53 = arith.constant 0 : index
      %c0_54 = arith.constant 0 : index
      %75 = vector.load %arg13[%c0_51, %c0_52, %c0_53, %c0_54] : memref<1x1x1x1xf32, #tpu.memory_space<vmem>>, vector<1x1x1x1xf32>
      %76 = vector.shape_cast %75 : vector<1x1x1x1xf32> to vector<1x1xf32>
      %77 = vector.shape_cast %74 : vector<1x1xf32> to vector<1x1x1x1xf32>
      tpu.vector_store %arg13[%c0_51, %c0_52, %c0_53, %c0_54], %77 {strides = array<i32>} : memref<1x1x1x1xf32, #tpu.memory_space<vmem>>, vector<1x1x1x1xf32>,
    } else {
    }
    return
  }
  func.func @transform_0(%arg0: i32, %arg1: i32, %arg2: i32, %arg3: i32) -> (i32, i32, i32) {
    %c0_i32 = arith.constant 0 : i32
    %c0_i32_0 = arith.constant 0 : i32
    %c0_i32_1 = arith.constant 0 : i32
    return %arg0, %c0_i32, %c0_i32_0 : i32, i32, i32
  }
  func.func @transform_1(%arg0: i32, %arg1: i32, %arg2: i32, %arg3: i32) -> (i32, i32, i32, i32) {
    %c0_i32 = arith.constant 0 : i32
    %c0_i32_0 = arith.constant 0 : i32
    return %arg0, %arg1, %arg2, %c0_i32 : i32, i32, i32, i32
  }
  func.func @transform_2(%arg0: i32, %arg1: i32, %arg2: i32, %arg3: i32) -> (i32, i32, i32) {
    %c0_i32 = arith.constant 0 : i32
    %c0_i32_0 = arith.constant 0 : i32
    return %arg1, %c0_i32, %arg3 : i32, i32, i32
  }
  func.func @transform_3(%arg0: i32, %arg1: i32, %arg2: i32, %arg3: i32) -> (i32, i32, i32) {
    %c0_i32 = arith.constant 0 : i32
    %c0_i32_0 = arith.constant 0 : i32
    return %arg1, %c0_i32, %arg3 : i32, i32, i32
  }
  func.func @transform_4(%arg0: i32, %arg1: i32, %arg2: i32, %arg3: i32) -> (i32, i32, i32, i32) {
    %c0_i32 = arith.constant 0 : i32
    %c0_i32_0 = arith.constant 0 : i32
    return %arg0, %arg1, %c0_i32, %arg3 : i32, i32, i32, i32
  }
  func.func @transform_5(%arg0: i32, %arg1: i32, %arg2: i32, %arg3: i32) -> (i32, i32) {
    %c0_i32 = arith.constant 0 : i32
    %c0_i32_0 = arith.constant 0 : i32
    return %arg2, %c0_i32 : i32, i32
  }
  func.func @transform_6(%arg0: i32, %arg1: i32, %arg2: i32, %arg3: i32) -> (i32, i32) {
    %c0_i32 = arith.constant 0 : i32
    %c0_i32_0 = arith.constant 0 : i32
    return %arg2, %c0_i32 : i32, i32
  }
  func.func @transform_7(%arg0: i32, %arg1: i32, %arg2: i32, %arg3: i32) -> (i32, i32) {
    %c0_i32 = arith.constant 0 : i32
    %c0_i32_0 = arith.constant 0 : i32
    return %arg2, %c0_i32 : i32, i32
  }
  func.func @transform_8(%arg0: i32, %arg1: i32, %arg2: i32, %arg3: i32) -> (i32, i32) {
    %c0_i32 = arith.constant 0 : i32
    %c0_i32_0 = arith.constant 0 : i32
    return %arg2, %c0_i32 : i32, i32
  }
  func.func @transform_9(%arg0: i32, %arg1: i32, %arg2: i32, %arg3: i32) -> (i32, i32, i32, i32) {
    %c0_i32 = arith.constant 0 : i32
    %c0_i32_0 = arith.constant 0 : i32
    %c0_i32_1 = arith.constant 0 : i32
    return %arg0, %arg1, %c0_i32, %c0_i32_0 : i32, i32, i32, i32
  }
}

</mosaic_0001>

<bundles_post_ra>
// kernel: tpu_custom_call.1
= control target key start
LH: loop header
LB: loop body
LE: loop exit
PB: predicated region body
PF: predicated region fallthrough
CT: control target
= control target key end

     0   :  { %s2747_s0 = inlined_call_operand.hbm [shape: f32[2,1,256], index: 0, kind: input, shape index: {}]   ;;  %s2748_s1 = inlined_call_operand.hbm [shape: f32[2,10,32,256], index: 1, kind: input, shape index: {}]   ;;  %s2749_s2 = inlined_call_operand.hbm [shape: f32[10,256,128], index: 2, kind: input, shape index: {}]   ;;  %s2750_s3 = inlined_call_operand.hbm [shape: f32[10,1,128], index: 3, kind: input, shape index: {}]   ;;  %s2751_s4 = inlined_call_operand.hbm [shape: f32[2,10,1,128], index: 4, kind: input, shape index: {}]   ;;  %s2752_s5 = inlined_call_operand.vmem [shape: f32[32,1], index: 5, kind: input, shape index: {}]   ;;  %s2753_s6 = inlined_call_operand.vmem [shape: f32[32,1], index: 6, kind: input, shape index: {}]   ;;  %s2754_s7 = inlined_call_operand.vmem [shape: f32[32,1], index: 7, kind: input, shape index: {}]   ;;  %s2755_s8 = inlined_call_operand.vmem [shape: f32[32,1], index: 8, kind: input, shape index: {}]   ;;  %s2756_s9 = inlined_call_operand.vmem [shape: f32[2,10,1,1], index: 9, kind: output, shape index: {}]  }
   0x1   :  { %2786 = sst [smem:[#allocation32_spill]] %s2748_s1 }
   0x2   :  { %2787 = sst [smem:[#allocation33_spill]] %s2750_s3 }
   0x3   :  { %2788 = sst [smem:[#allocation34_spill]] %s2752_s5 }
   0x4   :  { %2789 = sst [smem:[#allocation35_spill]] %s2753_s6 }
   0x5   :  { %2790 = sst [smem:[#allocation36_spill]] %s2754_s7 }
   0x6   :  { %2791 = sst [smem:[#allocation37_spill]] %s2755_s8 }
   0x7   :  { %2792 = sst [smem:[#allocation38_spill]] %s2756_s9 }
   0x8   :  { %14 = vsyncpa [#allocation8], 0 }
   0x9   :  { %16 = vsyncpa [#allocation8 + $0x1], 0 }
   0xa   :  { %17 = vsyncpa [#allocation10], 0 }
   0xb   :  { %19 = vsyncpa [#allocation10 + $0x1], 0 }
   0xc   :  { %20 = vsyncpa [#allocation13], 0 }
   0xd   :  { %22 = vsyncpa [#allocation13 + $0x1], 0  ;;  %s2103_s30 = smov 0   ;;  %s2105_s10 = smov 0  }
   0xe   :  { %s2107_s11 = smov 0   ;;  %s2109_s12 = smov 0  }
   0xf   :  { %s2111_s13 = smov 0   ;;  %s2113_s14 = smov 0  }
  0x10   :  { %s2115_s15 = smov 0   ;;  %s2117_s16 = smov 0  }
  0x11   :  { %s2119_s17 = smov 0   ;;  %s2121_s18 = smov 0  }
  0x12   :  { %s2123_s19 = smov 0   ;;  %s2125_s20 = smov 0  }
  0x13   :  { %s2127_s21 = smov 0   ;;  %s2129_s22 = smov 0  }
  0x14 LB: > { %2793 = sst [smem:[#allocation20_spill]] %s1991_s10  ;;  %p2763_p0 = scmp.eq.s32.totalorder %s2039_s22, 0  ;;  %s2039_s22 = sphi %s2129_s22, %s28_s22   ;;  %s2035_s21 = sphi %s2127_s21, %s2871_s21   ;;  %s2031_s20 = sphi %s2125_s20, %s2870_s20   ;;  %s2027_s19 = sphi %s2123_s19, %s2869_s19   ;;  %s2023_s18 = sphi %s2121_s18, %s2868_s18   ;;  %s2019_s17 = sphi %s2119_s17, %s2867_s17   ;;  %s2015_s16 = sphi %s2117_s16, %s2866_s16   ;;  %s2011_s15 = sphi %s2115_s15, %s2857_s15   ;;  %s2007_s14 = sphi %s2113_s14, %s2865_s14   ;;  %s2003_s13 = sphi %s2111_s13, %s2864_s13   ;;  %s1999_s12 = sphi %s2109_s12, %s2863_s12   ;;  %s1995_s11 = sphi %s2107_s11, %s2862_s11   ;;  %s1991_s10 = sphi %s2105_s10, %s2854_s10   ;;  %s1987_s30 = sphi %s2103_s30, %s2853_s30  }
  0x15   : > { %2794 = sst [smem:[#allocation21_spill]] %s1995_s11  ;;  %p98_p1 = scmp.ne.s32.totalorder %s2007_s14, %s2003_s13 }
  0x16   : > { %2795 = sst [smem:[#allocation22_spill]] %s2003_s13  ;;  %p2762_p3 = scmp.lt.s32.totalorder %s2039_s22, 20 }
  0x17   : > { %2796 = sst [smem:[#allocation23_spill]] %s2015_s16  ;;  %p100_p4 = por %p98_p1, %p2763_p0 }
  0x18   : > { %2797 = sst [smem:[#allocation24_spill]] %s2023_s18  ;;  %s2761_s25 = sand.u32 1, %s2007_s14  }
  0x19   : > { %2798 = sst [smem:[#allocation25_spill]] %s2027_s19  ;;  %s1474_s26 = sshll.u32 %s2761_s25, 6 }
  0x1a   : > { %s1475_s27 = sshll.u32 %s2031_s20, 3  ;;  %s1584_s28 = smul.u32 80, %s2035_s21 }
  0x1b   : > { %s405_s29 = scalar_lea.vmem [#allocation9], %s1474_s26  ;;  %p2190_p5 = pnand %p2762_p3, %p100_p4 }
  0x1c   : > { %s417_s8 = sshll.u32 %s405_s29, 4  ;;  %s414_s23 = sadd.s32 %s1584_s28, %s1475_s27  ;;  %s2194_s8 = int_to_ptr.vmem [resolvable:$true] %s417_s8 }
  0x1d   : > { %s2799_s9 = scalar_select %p2190_p5, 1, 0 }
  0x1e   : > { %s1476_s18 = sshll.u32 %s414_s23, 7  ;;  %s2800_s1 = sld [smem:[#allocation32_spill]] }
  0x1f   : > { %p1482_p6 = scmp.ge.s32.totalorder %s2039_s22, 1  ;;  %s2801_s26 = sand.u32 1, %s2039_s22  }
  0x20   : > { %s2204_s29 = scalar_lea.sflag [#allocation10], %s2801_s26  ;;  %p2774_p8 = pneg %p2190_p5 }
  0x24   : > { %s2199_s7 = scalar_lea.hbm %s2800_s1, %s1476_s18  ;;  %s1764_s18 = scalar_lea.hbm %s2800_s1, 20480 }
  0x25   : > { %s1759_s25 = scalar_lea.hbm %s2199_s7, 1024  ;;  %p1765_p11 = scmp.lt.u32.totalorder %s2199_s7, %s2800_s1 }
  0x26   : > { %p1760_p7 = scmp.ne.s32.totalorder %s2199_s7, %s1759_s25  ;;  %p1766_p12 = scmp.lt.u32.totalorder %s1764_s18, %s1759_s25 }
  0x27   : > { %p1768_p1 = scmp.lt.u32.totalorder %s1759_s25, %s2199_s7 }
  0x28   : > { %p1762_p9 = pnand %p2774_p8, %p1760_p7  ;;  %p1767_p13 = por %p1766_p12, %p1765_p11 }
  0x2a   : > { %p1763_p10 = pneg %p1762_p9  ;;  %p1769_p4 = por %p1768_p1, %p1767_p13 }
  0x2c   : > { %p1770_p3 = pnand %p1769_p4, %p1763_p10 }
  0x2e   : > { %1773 = shalt.err (!%p1770_p3)
}
  0x2f   : > { %s1774_s28 = scalar_lea.vmem %s2194_s8, 1024  ;;  %s2041_s26 = smov [#allocation9]  }
  0x30   : > { %p1775_p7 = scmp.ne.s32.totalorder %s2194_s8, %s1774_s28  ;;  %s1779_s23 = sshll.u32 %s2041_s26, 4  ;;  %s1780_s23 = int_to_ptr.vmem [resolvable:$false] %s1779_s23 }
  0x31   : > { %s1781_s19 = scalar_lea.vmem %s1780_s23, 2048  ;;  %p1782_p2 = scmp.lt.s32.totalorder %s2194_s8, %s1780_s23 }
  0x32   : > { %p1777_p9 = pnand %p1775_p7, %p2774_p8  ;;  %p1783_p11 = scmp.lt.s32.totalorder %s1781_s19, %s1774_s28 }
  0x34   : > { %p1778_p0 = pneg %p1777_p9  ;;  %p1784_p12 = por %p1783_p11, %p1782_p2 }
  0x36   : > { %p1785_p13 = pnand %p1784_p12, %p1778_p0 }
  0x38   : > { %1788 = shalt.err (!%p1785_p13)
}
  0x39   : > { %s2042_s25 = smov 256   ;;  %s2043_s18 = smov 16  }
  0x3a   : > { %1603 = dma.hbm_to_vmem [thread:$0]  (!%p2190_p5), %s2199_s7, 1024, %s2194_s8, %s2204_s29, %s2042_s25, %s2042_s25, %s2043_s18  }
  0x3b   : > { %p485_p0 = scmp.lt.s32.totalorder %s2039_s22, 21  ;;  %s2764_s27 = sadd.s32 4294967295, %s2039_s22  }
  0x3c   : > { %s50_s28 = sadd.s32 1, %s2031_s20  ;;  %p2247_p10 = scmp.eq.s32.totalorder %s2764_s27, 0 }
  0x3d   : > { %p2235_p2 = pnand %p1482_p6, %p485_p0  ;;  %p2241_p3 = scmp.ge.s32.totalorder %s50_s28, 10 }
  0x3e   : > { %s2805_s23 = scalar_select %p2247_p10, 1, 0 }
  0x3f   : > { %s2802_s24 = scalar_select %p2235_p2, 1, 0 }
  0x40   : > { %s119_s7 = sadd.s32 1, %s1995_s11  ;;  %p126_p6 = scmp.ne.s32.totalorder %s1995_s11, %s1991_s10 }
  0x41   : > { %2803 = sst [smem:[#allocation26_spill]] %s2802_s24  ;;  %s2873_s28 = smov (%p2241_p3, %s50_s28), 0 }
  0x42   : > { %2806 = sst [smem:[#allocation27_spill]] %s2873_s28  ;;  %p2807_p1 = scmp.ne.s32.totalorder %s2003_s13, %s1999_s12 }
  0x43   : > { %p2810_p7 = scmp.eq.s32.totalorder %s2039_s22, 0  ;;  %s2271_s19 = ssub.s32 %s2031_s20, %s2873_s28 }
  0x44   : > { %p2263_p4 = por %p2807_p1, %p2247_p10  ;;  %p132_p11 = scmp.ne.s32.totalorder %s1991_s10, %s1987_s30 }
  0x45   : > { %p128_p9 = por %p126_p6, %p2810_p7  ;;  %p117_p12 = scmp.eq.s32.totalorder %s2271_s19, 0 }
  0x46   : > { %s2808_s8 = scalar_select %p2263_p4, 1, 0 }
  0x47   : > { %s429_s25 = sand.u32 1, %s1995_s11   ;;  %p2279_p13 = por %p132_p11, %p2247_p10 }
  0x48   : > { %2809 = sst [smem:[#allocation28_spill]] %s2808_s8  ;;  %s1477_s12 = sshll.u32 %s429_s25, 8 }
  0x49   : > { %s2811_s18 = scalar_select %p2279_p13, 1, 0 }
  0x4a   : > { %s2284_s27 = scalar_select %p117_p12, %s1995_s11, %s119_s7  }
  0x4b   : > { %2812 = sst [smem:[#allocation29_spill]] %s2811_s18  ;;  %p2814_p0 = scmp.lt.s32.totalorder %s2039_s22, 20 }
  0x4c   : > { %2813 = sst [smem:[#allocation30_spill]] %s2284_s27  ;;  %s431_s28 = scalar_lea.vmem [#allocation11], %s1477_s12 }
  0x4d   : > { %p2288_p1 = pnand %p2814_p0, %p128_p9  ;;  %s439_s6 = sshll.u32 %s431_s28, 4  ;;  %s2292_s6 = int_to_ptr.vmem [resolvable:$true] %s439_s6 }
  0x4e   : > { %s1480_s30 = sshll.u32 %s2031_s20, 4  ;;  %s2816_s3 = sld [smem:[#allocation33_spill]] }
  0x4f   : > { %s452_s7 = scalar_lea.vmem [#allocation12], %s429_s25  ;;  %s2817_s11 = sand.u32 1, %s2039_s22  }
  0x50   : > { %s460_s27 = sshll.u32 %s452_s7, 4  ;;  %s2304_s18 = scalar_lea.sflag [#allocation13], %s2817_s11  ;;  %s2300_s27 = int_to_ptr.vmem [resolvable:$true] %s460_s27 }
  0x51   : > { %p2784_p7 = pneg %p2288_p1 }
  0x54   : > { %s2298_s8 = scalar_lea.hbm %s2816_s3, %s1480_s30  ;;  %s1794_s12 = scalar_lea.hbm %s2816_s3, 160 }
  0x55   : > { %s1789_s28 = scalar_lea.hbm %s2298_s8, 16  ;;  %p1795_p12 = scmp.lt.u32.totalorder %s2298_s8, %s2816_s3 }
  0x56   : > { %p1790_p6 = scmp.ne.s32.totalorder %s2298_s8, %s1789_s28  ;;  %p1796_p0 = scmp.lt.u32.totalorder %s1794_s12, %s1789_s28 }
  0x57   : > { %p1798_p13 = scmp.lt.u32.totalorder %s1789_s28, %s2298_s8 }
  0x58   : > { %p1792_p9 = pnand %p2784_p7, %p1790_p6  ;;  %p1797_p8 = por %p1796_p0, %p1795_p12 }
  0x5a   : > { %p1793_p11 = pneg %p1792_p9  ;;  %p1799_p4 = por %p1798_p13, %p1797_p8 }
  0x5c   : > { %p1800_p2 = pnand %p1799_p4, %p1793_p11 }
  0x5e   : > { %1803 = shalt.err (!%p1800_p2)
}
  0x5f   : > { %s1804_s11 = scalar_lea.vmem %s2300_s27, 16  ;;  %s2044_s7 = smov [#allocation12]  }
  0x60   : > { %p1805_p6 = scmp.ne.s32.totalorder %s2300_s27, %s1804_s11  ;;  %s1809_s5 = sshll.u32 %s2044_s7, 4  ;;  %s1810_s5 = int_to_ptr.vmem [resolvable:$false] %s1809_s5 }
  0x61   : > { %s1811_s10 = scalar_lea.vmem %s1810_s5, 32  ;;  %p1812_p10 = scmp.lt.s32.totalorder %s2300_s27, %s1810_s5 }
  0x62   : > { %p1807_p9 = pnand %p1805_p6, %p2784_p7  ;;  %p1813_p12 = scmp.lt.s32.totalorder %s1811_s10, %s1804_s11 }
  0x64   : > { %p1808_p5 = pneg %p1807_p9  ;;  %p1814_p0 = por %p1813_p12, %p1812_p10 }
  0x66   : > { %p1815_p8 = pnand %p1814_p0, %p1808_p5 }
  0x68   : > { %1818 = shalt.err (!%p1815_p8)
}
  0x69   : > { %1609 = dma.hbm_to_vmem [thread:$0]  (!%p2288_p1), %s2298_s8, 16, %s2300_s27, %s2304_s18  }
  0x6a   : > { %s54_s28 = sadd.s32 1, %s2035_s21  ;;  %s61_s12 = sadd.s32 1, %s2019_s17 }
  0x6b   : > { %s2875_s28 = smov (!%p2241_p3, %s54_s28), %s2035_s21  ;;  %p68_p5 = scmp.ne.s32.totalorder %s2019_s17, %s2015_s16 }
  0x6c   : > { %p56_p2 = scmp.ge.s32.totalorder %s2875_s28, 2  ;;  %p74_p10 = scmp.ne.s32.totalorder %s2015_s16, %s2011_s15 }
  0x6d   : > { %p2818_p4 = scmp.eq.s32.totalorder %s2039_s22, 0  ;;  %s382_s25 = sand.u32 1, %s2019_s17  }
  0x6e   : > { %s2877_s28 = smov (%p56_p2, %s2875_s28), 0  ;;  %p2821_p11 = scmp.ne.s32.totalorder %s2805_s23, 0 }
  0x6f   : > { %p2343_p13 = por %p2818_p4, %p68_p5  ;;  %2820 = sst [smem:[#allocation31_spill]] %s2877_s28 }
  0x70   : > { %p2352_p6 = por %p2821_p11, %p74_p10  ;;  %s58_s26 = ssub.s32 %s2035_s21, %s2877_s28 }
  0x71   : > { %s1471_s8 = sshll.u32 %s382_s25, 1  ;;  %p59_p3 = scmp.eq.s32.totalorder %s58_s26, 0 }
  0x72   : > { %s2822_s27 = scalar_select %p2352_p6, 1, 0 }
  0x73   : > { %s86_s15 = sor.u32 %s2271_s19, %s58_s26  ;;  %s2823_s7 = sadd.s32 1, %s2007_s14 }
  0x74   : > { %p89_p9 = scmp.eq.s32.totalorder %s86_s15, 0  ;;  %s1490_s10 = sshll.u32 %s2035_s21, 5 }
  0x75   : > { %s2360_s11 = scalar_select %p59_p3, %s2019_s17, %s61_s12  }
  0x76   : > { %s2365_s5 = scalar_select %p89_p9, %s2007_s14, %s2823_s7  }
  0x77   : > { %s386_s3 = scalar_lea.vmem [#allocation7], %s1471_s8  ;;  %s2371_s24 = scalar_lea.hbm %s2747_s0, %s1490_s10 }
  0x78   : > { %s394_s13 = sshll.u32 %s386_s3, 4  ;;  %p2824_p12 = scmp.lt.s32.totalorder %s2039_s22, 20  ;;  %s2373_s13 = int_to_ptr.vmem [resolvable:$true] %s394_s13 }
  0x79   : > { %s1491_s3 = sshll.u32 %s2031_s20, 12  ;;  %s383_s8 = scalar_lea.sflag [#allocation8], %s382_s25 }
  0x7a   : > { %p2379_p0 = pnand %p2824_p12, %p2343_p13  ;;  %s2387_s16 = scalar_lea.hbm %s2749_s2, %s1491_s3 }
  0x7b   : > { %s1819_s15 = scalar_lea.hbm %s2371_s24, 32  ;;  %s1824_s10 = scalar_lea.hbm %s2747_s0, 64 }
  0x7c   : > { %p1820_p8 = scmp.ne.s32.totalorder %s2371_s24, %s1819_s15  ;;  %p1821_p5 = pneg %p2379_p0 }
  0x7d   : > { %p1825_p4 = scmp.lt.u32.totalorder %s2371_s24, %s2747_s0  ;;  %p1826_p13 = scmp.lt.u32.totalorder %s1824_s10, %s1819_s15 }
  0x7e   : > { %p1822_p2 = pnand %p1821_p5, %p1820_p8  ;;  %p1828_p3 = scmp.lt.u32.totalorder %s1819_s15, %s2371_s24 }
  0x7f   : > { %p1827_p11 = por %p1826_p13, %p1825_p4 }
  0x80   : > { %p1823_p10 = pneg %p1822_p2 }
  0x81   : > { %p1829_p9 = por %p1828_p3, %p1827_p11 }
  0x83   : > { %p1830_p12 = pnand %p1829_p9, %p1823_p10 }
  0x85   : > { %1833 = shalt.err (!%p1830_p12)
}
  0x86   : > { %s1834_s25 = scalar_lea.vmem %s2373_s13, 32  ;;  %s2045_s3 = smov [#allocation7]  }
  0x87   : > { %p1835_p8 = scmp.ne.s32.totalorder %s2373_s13, %s1834_s25  ;;  %s1839_s12 = sshll.u32 %s2045_s3, 4  ;;  %s1840_s12 = int_to_ptr.vmem [resolvable:$false] %s1839_s12 }
  0x88   : > { %s1841_s28 = scalar_lea.vmem %s1840_s12, 64  ;;  %p1842_p6 = scmp.lt.s32.totalorder %s2373_s13, %s1840_s12 }
  0x89   : > { %p1837_p2 = pnand %p1835_p8, %p1821_p5  ;;  %p1843_p4 = scmp.lt.s32.totalorder %s1841_s28, %s1834_s25 }
  0x8b   : > { %p1838_p7 = pneg %p1837_p2  ;;  %p1844_p13 = por %p1843_p4, %p1842_p6 }
  0x8d   : > { %p1845_p11 = pnand %p1844_p13, %p1838_p7 }
  0x8f   : > { %1848 = shalt.err (!%p1845_p11)
}
  0x90   : > { %1600 = dma.hbm_to_vmem [thread:$0]  (!%p2379_p0), %s2371_s24, 32, %s2373_s13, %s383_s8  }
  0x91   : > { %s1849_s26 = scalar_lea.hbm %s2387_s16, 4096  ;;  %p2826_p10 = pneg %p2288_p1 }
  0x92   : > { %p1850_p5 = scmp.ne.s32.totalorder %s2387_s16, %s1849_s26  ;;  %s1854_s7 = scalar_lea.hbm %s2749_s2, 40960 }
  0x93   : > { %p1855_p7 = scmp.lt.u32.totalorder %s2387_s16, %s2749_s2  ;;  %p1856_p6 = scmp.lt.u32.totalorder %s1854_s7, %s1849_s26 }
  0x94   : > { %p1852_p3 = pnand %p1850_p5, %p2826_p10  ;;  %p1858_p8 = scmp.lt.u32.totalorder %s1849_s26, %s2387_s16 }
  0x95   : > { %p1857_p12 = por %p1856_p6, %p1855_p7 }
  0x96   : > { %p1853_p9 = pneg %p1852_p3 }
  0x97   : > { %p1859_p2 = por %p1858_p8, %p1857_p12 }
  0x99   : > { %p1860_p4 = pnand %p1859_p2, %p1853_p9 }
  0x9b   : > { %1863 = shalt.err (!%p1860_p4)
}
  0x9c   : > { %s1864_s13 = scalar_lea.vmem %s2292_s6, 4096  ;;  %p2827_p13 = pmov %p2826_p10 }
  0x9d   : > { %p1865_p0 = scmp.ne.s32.totalorder %s2292_s6, %s1864_s13  ;;  %s2046_s24 = smov [#allocation11]  }
  0x9e   : > { %s1869_s8 = sshll.u32 %s2046_s24, 4  ;;  %s1870_s8 = int_to_ptr.vmem [resolvable:$false] %s1869_s8 }
  0x9f   : > { %p1867_p11 = pnand %p1865_p0, %p2827_p13  ;;  %s1871_s23 = scalar_lea.vmem %s1870_s8, 8192 }
  0xa0   : > { %p1872_p10 = scmp.lt.s32.totalorder %s2292_s6, %s1870_s8  ;;  %p1873_p3 = scmp.lt.s32.totalorder %s1871_s23, %s1864_s13 }
  0xa1   : > { %p1868_p5 = pneg %p1867_p11 }
  0xa2   : > { %p1874_p7 = por %p1873_p3, %p1872_p10 }
  0xa4   : > { %p1875_p6 = pnand %p1874_p7, %p1868_p5 }
  0xa6   : > { %1878 = shalt.err (!%p1875_p6)
}
  0xa7   : > { %s2047_s25 = smov 128   ;;  %s2048_s3 = smov 8  }
  0xa8   : > { %1606 = dma.hbm_to_vmem [thread:$0]  (!%p2288_p1), %s2387_s16, 4096, %s2292_s6, %s2204_s29, %s2047_s25, %s2047_s25, %s2048_s3  }
  0xa9   : > { %s1585_s12 = smul.u32 10, %s2035_s21  ;;  %s2828_s28 = sand.u32 1, %s2007_s14  }
  0xaa   : > { %s470_s26 = scalar_lea.vmem [#allocation14], %s2828_s28  ;;  %p2829_p12 = scmp.ne.s32.totalorder %s2799_s9, 0 }
  0xab   : > { %s480_s15 = sshll.u32 %s470_s26, 4  ;;  %s476_s30 = sadd.s32 %s2031_s20, %s1585_s12  ;;  %s2442_s15 = int_to_ptr.vmem [resolvable:$true] %s480_s15 }
  0xac   : > { %s1481_s7 = sshll.u32 %s476_s30, 4  ;;  %p2830_p8 = pneg %p2829_p12 }
  0xad   : > { %s478_s13 = scalar_lea.hbm %s2751_s4, %s1481_s7  ;;  %s1884_s29 = scalar_lea.hbm %s2751_s4, 320 }
  0xae   : > { %s1879_s24 = scalar_lea.hbm %s478_s13, 16  ;;  %p1885_p1 = scmp.lt.u32.totalorder %s478_s13, %s2751_s4 }
  0xaf   : > { %p1880_p9 = scmp.ne.s32.totalorder %s478_s13, %s1879_s24  ;;  %p1886_p0 = scmp.lt.u32.totalorder %s1884_s29, %s1879_s24 }
  0xb0   : > { %p1888_p11 = scmp.lt.u32.totalorder %s1879_s24, %s478_s13 }
  0xb1   : > { %p1882_p2 = pnand %p1880_p9, %p2830_p8  ;;  %p1887_p13 = por %p1886_p0, %p1885_p1 }
  0xb3   : > { %p1883_p4 = pneg %p1882_p2  ;;  %p1889_p5 = por %p1888_p11, %p1887_p13 }
  0xb5   : > { %p1890_p10 = pnand %p1889_p5, %p1883_p4 }
  0xb7   : > { %1893 = shalt.err (!%p1890_p10)
}
  0xb8   : > { %s1894_s23 = scalar_lea.vmem %s2442_s15, 16  ;;  %p2831_p7 = pmov %p2830_p8 }
  0xb9   : > { %p1895_p3 = scmp.ne.s32.totalorder %s2442_s15, %s1894_s23  ;;  %s2049_s25 = smov [#allocation14]  }
  0xba   : > { %s1899_s3 = sshll.u32 %s2049_s25, 4  ;;  %s1900_s3 = int_to_ptr.vmem [resolvable:$false] %s1899_s3 }
  0xbb   : > { %p1897_p6 = pnand %p1895_p3, %p2831_p7  ;;  %s1901_s12 = scalar_lea.vmem %s1900_s3, 32 }
  0xbc   : > { %p1902_p8 = scmp.lt.s32.totalorder %s2442_s15, %s1900_s3  ;;  %p1903_p2 = scmp.lt.s32.totalorder %s1901_s12, %s1894_s23 }
  0xbd   : > { %p1898_p9 = pneg %p1897_p6 }
  0xbe   : > { %p1904_p1 = por %p1903_p2, %p1902_p8 }
  0xc0   : > { %p1905_p0 = pnand %p1904_p1, %p1898_p9 }
  0xc2   : > { %1908 = shalt.err (!%p1905_p0)
}
  0xc3   : > { %1612 = dma.hbm_to_vmem [thread:$0]  (!%p2829_p12), %s478_s13, 16, %s2442_s15, %s2304_s18  }
  0xc4   : > { %s2832_s28 = sld [smem:[#allocation26_spill]] }
  0xca   : > { %p2833_p4 = scmp.ne.s32.totalorder %s2832_s28, 0 }
  0xcb   : > { %s2834_s26 = sld [smem:[#allocation23_spill]] (!%p2833_p4)  ;;  %p2835_p13 = scmp.ne.s32.totalorder (!%p2833_p4), %s2822_s27, 0 }
  0xcc   : > { %489 = sbr.rel (%p2833_p4) target bundleno = 1160 (0x488), region = 56 }
  0xd1   : > { %s491_s30 = sand.u32 (!%p2833_p4), 1, %s2834_s26  }
  0xd2   : > { %s2469_s7 = sshll.u32 (!%p2833_p4), %s491_s30, 1  ;;  %s492_s10 = scalar_lea.sflag (!%p2833_p4), [#allocation8], %s491_s30 }
  0xd3   : > { %s495_s19 = scalar_lea.vmem [#allocation7], %s2469_s7 }
  0xd4   : > { %1966 = dma.done.wait (%p2835_p13), %s492_s10, 32  }
  0xd5   : > { %1968 = vsyncadd (%p2835_p13), %s492_s10, 4294967264  ;;  %s2836_s9 = sadd.s32 4294967295, %s2039_s22   ;;  %s2837_s24 = sld [smem:[#allocation22_spill]] }
  0xd6   : > { %s2838_s18 = sld [smem:[#allocation28_spill]]  ;;  %s500_s15 = sand.u32 1, %s2836_s9  }
  0xd7   : > { %s501_s6 = scalar_lea.sflag [#allocation10], %s500_s15 }
  0xdb   : > { %s502_s13 = sand.u32 1, %s2837_s24  }
  0xdc   : > { %s1484_s1 = sshll.u32 %s502_s13, 6  ;;  %p2839_p12 = scmp.ne.s32.totalorder %s2838_s18, 0 }
  0xdd   : > { %s2479_s29 = scalar_lea.vmem [#allocation9], %s1484_s1 }
  0xde   : > { %1970 = dma.done.wait (%p2839_p12), %s501_s6, 1024  }
  0xdf   : > { %1972 = vsyncadd (%p2839_p12), %s501_s6, 4294966272  ;;  %s2840_s16 = sld [smem:[#allocation20_spill]]  ;;  %s2841_s8 = sld [smem:[#allocation29_spill]] }
  0xe5   : > { %s511_s23 = sand.u32 1, %s2840_s16   ;;  %p2842_p11 = scmp.ne.s32.totalorder %s2841_s8, 0 }
  0xe6   : > { %s1485_s27 = sshll.u32 %s511_s23, 8 }
  0xe7   : > { %s2486_s25 = scalar_lea.vmem [#allocation11], %s1485_s27 }
  0xe8   : > { %1974 = dma.done.wait (%p2842_p11), %s501_s6, 4096  }
  0xe9   : > { %1976 = vsyncadd (%p2842_p11), %s501_s6, 4294963200  ;;  %s519_s3 = scalar_lea.sflag [#allocation13], %s500_s15  ;;  %s2492_s12 = scalar_lea.vmem [#allocation12], %s511_s23 }
  0xea   : > { %1978 = dma.done.wait (%p2842_p11), %s519_s3, 16  }
  0xeb   : > { %1980 = vsyncadd (%p2842_p11), %s519_s3, 4294967280  ;;  %s2498_s28 = scalar_lea.vmem [#allocation14], %s502_s13 }
  0xec   : > { %1982 = dma.done.wait (%p2839_p12), %s519_s3, 16  }
  0xed   : > { %1984 = vsyncadd (%p2839_p12), %s519_s3, 4294967280  ;;  %v2050_v0 = vmov 0   ;;  %s2843_s10 = sld [smem:[#allocation34_spill]]  ;;  %s2845_s16 = sld [smem:[#allocation35_spill]]  ;;  %v812_v5 = vld [vmem:[%s2486_s25 + $0x80] sm:$0xff]  ;;  %v813_v6 = vld [vmem:[%s2486_s25 + $0x88] sm:$0xff]  ;;  %v673_v57 = vlaneseq }
  0xee   : > { %1734 = vset.pattern.permute.xlu1 %v2050_v0  ;;  %1733 = vset.pattern.permute.xlu0 %v2050_v0  ;;  %v796_v7 = vld [vmem:[%s2486_s25] sm:$0xff]  ;;  %v797_v8 = vld [vmem:[%s2486_s25 + $0x8] sm:$0xff]  ;;  %v1536_v9 = vpack.c.bf16 %v813_v6, %v812_v5  ;;  %v814_v11 = vld [vmem:[%s2486_s25 + $0x90] sm:$0xff]  ;;  %vm767_vm0 = vcmask 7168   ;;  %s2849_s23 = sld [smem:[#allocation24_spill]]  ;;  %vm642_vm1 = vcmask 0  }
  0xef   : > { %v1538_v10 = vpack.c.bf16 %v797_v8, %v796_v7  ;;  %v815_v12 = vld [vmem:[%s2486_s25 + $0x98] sm:$0xff]  ;;  %v798_v13 = vld [vmem:[%s2486_s25 + $0x10] sm:$0xff]  ;;  %v816_v16 = vld [vmem:[%s2486_s25 + $0xa0] sm:$0xff]  ;;  %v674_v58 = vshrl.u32 %v673_v57, 7  ;;  %s2851_s7 = sld [smem:[#allocation37_spill]] }
  0xf0   : > { %v1540_v14 = vpack.c.bf16 %v815_v12, %v814_v11  ;;  %v799_v15 = vld [vmem:[%s2486_s25 + $0x18] sm:$0xff]  ;;  %v817_v17 = vld [vmem:[%s2486_s25 + $0xa8] sm:$0xff]  ;;  %1537 = vmatprep.subr.bf16.mxu0 %v1536_v9  ;;  %1568 = vmatprep.subr.bf16.mxu1 %v1536_v9  ;;  %v800_v22 = vld [vmem:[%s2486_s25 + $0x20] sm:$0xff] }
  0xf1   : > { %1539 = vmatpush3.bf16.msra.mxu0 %v1538_v10  ;;  %1576 = vmatpush3.bf16.msra.mxu1 %v1538_v10  ;;  %v1542_v20 = vpack.c.bf16 %v799_v15, %v798_v13  ;;  %v1544_v21 = vpack.c.bf16 %v817_v17, %v816_v16  ;;  %v801_v23 = vld [vmem:[%s2486_s25 + $0x28] sm:$0xff]  ;;  %v818_v24 = vld [vmem:[%s2486_s25 + $0xb0] sm:$0xff]  ;;  %v819_v25 = vld [vmem:[%s2486_s25 + $0xb8] sm:$0xff]  ;;  %v675_v59 = vsub.s32 0, %v674_v58  ;;  %v679_v60 = vsub.s32 1, %v674_v58 }
  0xf2   : > { %1541 = vmatprep.subr.bf16.mxu0 %v1540_v14  ;;  %1569 = vmatprep.subr.bf16.mxu1 %v1540_v14  ;;  %v1546_v28 = vpack.c.bf16 %v801_v23, %v800_v22  ;;  %v1548_v29 = vpack.c.bf16 %v819_v25, %v818_v24  ;;  %v802_v30 = vld [vmem:[%s2486_s25 + $0x30] sm:$0xff]  ;;  %v803_v31 = vld [vmem:[%s2486_s25 + $0x38] sm:$0xff]  ;;  %v820_v32 = vld [vmem:[%s2486_s25 + $0xc0] sm:$0xff] }
  0xf3   : > { %s2844_s9 = smov %s2843_s10  ;;  %v2507_v1 = vld [vmem:[%s2843_s10 + $0x8] sm:$0xff]  ;;  %s2846_s8 = smov %s2845_s16  ;;  %v691_v4 = vld [vmem:[%s2845_s16] sm:$0xff]  ;;  %v1550_v34 = vpack.c.bf16 %v803_v31, %v802_v30  ;;  %v822_v38 = vld [vmem:[%s2486_s25 + $0xd0] sm:$0xff] }
  0xf4   : > { %v2512_v2 = vld [vmem:[%s2844_s9] sm:$0xff]  ;;  %659 = vperm.xlu1 %1734, %v2507_v1   ;;  %v2519_v3 = vld [vmem:[%s2844_s9 + $0x10] sm:$0xff]  ;;  %v692_v19 = vld [vmem:[%s2846_s8 + $0x8] sm:$0xff]  ;;  %p631_p10 = scmp.lt.s32.totalorder %s2849_s23, 9  ;;  %s2850_s10 = sld [smem:[#allocation38_spill]] }
  0xf5   : > { %654 = vperm.xlu0 %1733, %v2512_v2   ;;  %v693_v18 = vld [vmem:[%s2846_s8 + $0x10] sm:$0xff]  ;;  %v694_v26 = vld [vmem:[%s2846_s8 + $0x18] sm:$0xff]  ;;  %1543 = vmatpush3.bf16.msra.mxu0 %v1542_v20  ;;  %v804_v36 = vld [vmem:[%s2486_s25 + $0x40] sm:$0xff]  ;;  %v919_v57 = vmul.f32 2.0, %v2519_v3  ;;  %v969_v58 = vmul.f32 %v2512_v2, %v2512_v2 }
  0xf6   : > { %v2551_v27 = vld [vmem:[%s2844_s9 + $0x18] sm:$0xff]  ;;  %1577 = vmatpush3.bf16.msra.mxu1 %v1542_v20  ;;  %1545 = vmatprep.subr.bf16.mxu0 %v1544_v21  ;;  %v821_v33 = vld [vmem:[%s2486_s25 + $0xc8] sm:$0xff]  ;;  %v824_v44 = vld [vmem:[%s2486_s25 + $0xe0] sm:$0xff]  ;;  %s2881_s23 = smov (!%p631_p10, %s2849_s23), 9 }
  0xf7   : > { %1570 = vmatprep.subr.bf16.mxu1 %v1544_v21  ;;  %v1552_v35 = vpack.c.bf16 %v821_v33, %v820_v32  ;;  %v805_v37 = vld [vmem:[%s2486_s25 + $0x48] sm:$0xff]  ;;  %v823_v39 = vld [vmem:[%s2486_s25 + $0xd8] sm:$0xff]  ;;  %v806_v42 = vld [vmem:[%s2486_s25 + $0x50] sm:$0xff] }
  0xf8   : > { %664 = vperm.xlu1 %1734, %v2519_v3   ;;  %v1554_v40 = vpack.c.bf16 %v805_v37, %v804_v36  ;;  %v1556_v41 = vpack.c.bf16 %v823_v39, %v822_v38  ;;  %v807_v43 = vld [vmem:[%s2486_s25 + $0x58] sm:$0xff]  ;;  %v825_v45 = vld [vmem:[%s2486_s25 + $0xe8] sm:$0xff]  ;;  %v808_v48 = vld [vmem:[%s2486_s25 + $0x60] sm:$0xff] }
  0xf9   : > { %705 = vperm.xlu0 %1733, %v691_v4   ;;  %1547 = vmatpush3.bf16.msra.mxu0 %v1546_v28  ;;  %v1558_v46 = vpack.c.bf16 %v807_v43, %v806_v42  ;;  %v1560_v47 = vpack.c.bf16 %v825_v45, %v824_v44  ;;  %v809_v49 = vld [vmem:[%s2486_s25 + $0x68] sm:$0xff]  ;;  %v826_v50 = vld [vmem:[%s2486_s25 + $0xf0] sm:$0xff]  ;;  %v827_v51 = vld [vmem:[%s2486_s25 + $0xf8] sm:$0xff] }
  0xfa   : > { %1578 = vmatpush3.bf16.msra.mxu1 %v1546_v28  ;;  %1549 = vmatprep.subr.bf16.mxu0 %v1548_v29  ;;  %v1562_v52 = vpack.c.bf16 %v809_v49, %v808_v48  ;;  %v1564_v53 = vpack.c.bf16 %v827_v51, %v826_v50  ;;  %v810_v54 = vld [vmem:[%s2486_s25 + $0x70] sm:$0xff]  ;;  %v811_v55 = vld [vmem:[%s2486_s25 + $0x78] sm:$0xff]  ;;  %v695_v5 = vld [vmem:[%s2479_s29] sm:$0xff] }
  0xfb   : > { %1571 = vmatprep.subr.bf16.mxu1 %v1548_v29  ;;  %v1566_v56 = vpack.c.bf16 %v811_v55, %v810_v54  ;;  %v651_v61 = vld [vmem:[%s495_s19] sm:$0x3]  ;;  %v696_v6 = vld [vmem:[%s2479_s29 + $0x8] sm:$0xff]  ;;  %v699_v13 = vld [vmem:[%s2479_s29 + $0x20] sm:$0xff] }
  0xfc   : > { %715 = vperm.xlu1 %1734, %v693_v18   ;;  %v676_v0 = vrot.slane %v651_v61, %v675_v59  ;;  %v680_v4 = vrot.slane %v651_v61, %v679_v60  ;;  %v700_v14 = vld [vmem:[%s2479_s29 + $0x28] sm:$0xff]  ;;  %v697_v15 = vld [vmem:[%s2479_s29 + $0x10] sm:$0xff]  ;;  %v698_v16 = vld [vmem:[%s2479_s29 + $0x18] sm:$0xff]  ;;  %v918_v59 = vmul.f32 2.0, %v2507_v1  ;;  %v920_v60 = vmul.f32 2.0, %v2551_v27 }
  0xfd   : > { %710 = vperm.xlu0 %1733, %v692_v19   ;;  %1551 = vmatpush3.bf16.msra.mxu0 %v1550_v34  ;;  %v701_v30 = vld [vmem:[%s2479_s29 + $0x30] sm:$0xff]  ;;  %v702_v31 = vld [vmem:[%s2479_s29 + $0x38] sm:$0xff]  ;;  %v970_v61 = vmul.f32 %v2507_v1, %v2507_v1  ;;  %s2847_s29 = sld [smem:[#allocation36_spill]] }
  0xfe   : > { %1579 = vmatpush3.bf16.msra.mxu1 %v1550_v34  ;;  %1553 = vmatprep.subr.bf16.mxu0 %v1552_v35 }
  0xff   : > { %1572 = vmatprep.subr.bf16.mxu1 %v1552_v35 }
 0x100   : > { %720 = vperm.xlu1 %1734, %v694_v26  }
 0x101   : > { %669 = vperm.xlu0 %1733, %v2551_v27   ;;  %1555 = vmatpush3.bf16.msra.mxu0 %v1554_v40 }
 0x102   : > { %1580 = vmatpush3.bf16.msra.mxu1 %v1554_v40  ;;  %1557 = vmatprep.subr.bf16.mxu0 %v1556_v41 }
 0x103   : > { %1573 = vmatprep.subr.bf16.mxu1 %v1556_v41 }
 0x105   : > { %1559 = vmatpush3.bf16.msra.mxu0 %v1558_v46 }
 0x106   : > { %1581 = vmatpush3.bf16.msra.mxu1 %v1558_v46  ;;  %1561 = vmatprep.subr.bf16.mxu0 %v1560_v47 }
 0x107   : > { %1574 = vmatprep.subr.bf16.mxu1 %v1560_v47 }
 0x109   : > { %1563 = vmatpush3.bf16.msra.mxu0 %v1562_v52 }
 0x10a   : > { %1582 = vmatpush3.bf16.msra.mxu1 %v1562_v52  ;;  %1565 = vmatprep.subr.bf16.mxu0 %v1564_v53 }
 0x10b   : > { %1575 = vmatprep.subr.bf16.mxu1 %v1564_v53 }
 0x10d   : > { %1567 = vmatpush3.bf16.msra.mxu0 %v1566_v56 }
 0x10e   : > { %1583 = vmatpush3.bf16.msra.mxu1 %v1566_v56  ;;  %v917_v56 = vmul.f32 2.0, %v2512_v2 }
 0x173   : > { %v660_v62 = vpop.permute.xlu1 %659 }
 0x174   : > { %v655_v63 = vpop.permute.xlu0 %654  ;;  %v685_v19 = vmul.f32 %v676_v0, %v660_v62  ;;  %v686_v20 = vmul.f32 %v680_v4, %v660_v62  ;;  %v971_v62 = vmul.f32 %v2519_v3, %v2519_v3  ;;  %v972_v3 = vmul.f32 %v2551_v27, %v2551_v27  ;;  %v1014_v27 = vld [vmem:[%s2847_s29 + $0x10] sm:$0xff] }
 0x175   : > { %v683_v9 = vmul.f32 %v676_v0, %v655_v63  ;;  %v684_v10 = vmul.f32 %v680_v4, %v655_v63  ;;  %v1012_v63 = vld [vmem:[%s2847_s29] sm:$0xff] }
 0x177   : > { %v665_v7 = vpop.permute.xlu1 %664 }
 0x178   : > { %v706_v8 = vpop.permute.xlu0 %705  ;;  %v687_v21 = vmul.f32 %v676_v0, %v665_v7  ;;  %v688_v22 = vmul.f32 %v680_v4, %v665_v7  ;;  %v1013_v7 = vld [vmem:[%s2847_s29 + $0x8] sm:$0xff] }
 0x179   : > { %v723_v11 = vmul.f32 %v706_v8, %v695_v5  ;;  %v724_v12 = vmul.f32 %v706_v8, %v696_v6 }
 0x17b   : > { %v731_v17 = vadd.f32 %v723_v11, %v683_v9  ;;  %v732_v18 = vadd.f32 %v724_v12, %v684_v10  ;;  %v716_v23 = vpop.permute.xlu1 %715  ;;  %v1015_v9 = vld [vmem:[%s2847_s29 + $0x18] sm:$0xff]  ;;  %v2051_v11 = vmov -3e+38  }
 0x17c   : > { %v711_v24 = vpop.permute.xlu0 %710  ;;  %v727_v25 = vmul.f32 %v716_v23, %v699_v13  ;;  %v728_v26 = vmul.f32 %v716_v23, %v700_v14  ;;  %772 = vst.msk [vmem:[#allocation4] sm:$0xff] %vm767_vm0, %v2051_v11  ;;  %773 = vst.msk [vmem:[#allocation4 + $0x8] sm:$0xff] %vm767_vm0, %v2051_v11 }
 0x17d   : > { %v725_v28 = vmul.f32 %v711_v24, %v697_v15  ;;  %v726_v29 = vmul.f32 %v711_v24, %v698_v16  ;;  %892 = vmatprep.mubr.f32.mxu0 %v732_v18  ;;  %v747_v32 = vmul.f32 %v731_v17, %v731_v17  ;;  %v748_v33 = vmul.f32 %v732_v18, %v732_v18 }
 0x17e   : > { %893 = vmatmul.mubr.f32.vlgmr.msra.gmra.mrb[0].mxu0 %v731_v17  ;;  %v735_v34 = vadd.f32 %v727_v25, %v687_v21  ;;  %v736_v37 = vadd.f32 %v728_v26, %v688_v22  ;;  %774 = vst.msk [vmem:[#allocation4 + $0x10] sm:$0xff] %vm767_vm0, %v2051_v11  ;;  %775 = vst.msk [vmem:[#allocation4 + $0x18] sm:$0xff] %vm767_vm0, %v2051_v11 }
 0x17f   : > { %v733_v35 = vadd.f32 %v725_v28, %v685_v19  ;;  %v734_v36 = vadd.f32 %v726_v29, %v686_v20  ;;  %v721_v38 = vpop.permute.xlu1 %720  ;;  %v755_v40 = vadd.f32 %v748_v33, %v747_v32  ;;  %v1486_v32 = vld [vmem:[%s2492_s12] ss:$0 sm:$0xff]  ;;  %s2848_s12 = sld [smem:[#allocation25_spill]] }
 0x180   : > { %v670_v39 = vpop.permute.xlu0 %669  ;;  %v729_v41 = vmul.f32 %v721_v38, %v701_v30  ;;  %v730_v42 = vmul.f32 %v721_v38, %v702_v31  ;;  %902 = vmatprep.mubr.f32.mxu1 %v736_v37  ;;  %v751_v45 = vmul.f32 %v735_v34, %v735_v34  ;;  %v752_v46 = vmul.f32 %v736_v37, %v736_v37 }
 0x181   : > { %v689_v43 = vmul.f32 %v676_v0, %v670_v39  ;;  %v690_v44 = vmul.f32 %v680_v4, %v670_v39  ;;  %756 = vadd.xlane.f32.xlu0 %v755_v40  ;;  %897 = vmatprep.mubr.f32.mxu0 %v734_v36  ;;  %v749_v47 = vmul.f32 %v733_v35, %v733_v35 }
 0x182   : > { %898 = vmatmul.mubr.f32.gmra.mrb[2].mxu0 %v733_v35  ;;  %903 = vmatmul.mubr.f32.vlgmr.msra.gmra.mrb[0].mxu1 %v735_v34  ;;  %v750_v50 = vmul.f32 %v734_v36, %v734_v36  ;;  %v761_v51 = vadd.f32 %v752_v46, %v751_v45 }
 0x183   : > { %v737_v48 = vadd.f32 %v729_v41, %v689_v43  ;;  %v738_v49 = vadd.f32 %v730_v42, %v690_v44 }
 0x184   : > { %v758_v52 = vadd.f32 %v750_v50, %v749_v47 }
 0x185   : > { %907 = vmatprep.mubr.f32.mxu1 %v738_v49  ;;  %v753_v53 = vmul.f32 %v737_v48, %v737_v48  ;;  %v754_v54 = vmul.f32 %v738_v49, %v738_v49  ;;  %762 = vadd.xlane.f32.xlu0 %v761_v51  ;;  %p629_p5 = scmp.lt.s32.totalorder %s2848_s12, 1 }
 0x186   : > { %759 = vadd.xlane.f32.xlu1 %v758_v52  ;;  %908 = vmatmul.mubr.f32.gmra.mrb[2].mxu1 %v737_v48 }
 0x187   : > { %v764_v55 = vadd.f32 %v754_v54, %v753_v53  ;;  %s2879_s12 = smov (!%p629_p5, %s2848_s12), 1 }
 0x188   : > { %s1586_s27 = smul.u32 10, %s2879_s12 }
 0x189   : > { %765 = vadd.xlane.f32.xlu0 %v764_v55 }
 0x18a   : > { %s634_s3 = sadd.s32 %s1586_s27, %s2881_s23 }
 0x18b   : > { %s2662_s24 = scalar_lea.vmem %s2850_s10, %s634_s3 }
 0x197   : > { %923 = vperm.xlu1 %1734, %v917_v56  }
 0x19b   : > { %933 = vperm.xlu1 %1734, %v919_v57  }
 0x19f   : > { %976 = vperm.xlu1 %1734, %v969_v58   ;;  %928 = vperm.xlu0 %1733, %v918_v59  }
 0x1a3   : > { %938 = vperm.xlu1 %1734, %v920_v60   ;;  %981 = vperm.xlu0 %1733, %v970_v61  }
 0x1a7   : > { %986 = vperm.xlu1 %1734, %v971_v62   ;;  %1018 = vperm.xlu0 %1733, %v1012_v63  }
 0x20e   : > { %v757_v2 = vpop.xlane.xlu0 %756 }
 0x20f   : > { %768 = vst.msk [vmem:[#allocation3] sm:$0xff] %vm767_vm0, %v757_v2 }
 0x212   : > { %v763_v0 = vpop.xlane.xlu0 %762 }
 0x213   : > { %v760_v4 = vpop.xlane.xlu1 %759  ;;  %770 = vst.msk [vmem:[#allocation3 + $0x10] sm:$0xff] %vm767_vm0, %v763_v0 }
 0x214   : > { %769 = vst.msk [vmem:[#allocation3 + $0x8] sm:$0xff] %vm767_vm0, %v760_v4  ;;  %v2052_v4 = vmov 0.0  }
 0x215   : > { %776 = vst.msk [vmem:[#allocation5] sm:$0xff] %vm767_vm0, %v2052_v4  ;;  %777 = vst.msk [vmem:[#allocation5 + $0x8] sm:$0xff] %vm767_vm0, %v2052_v4 }
 0x216   : > { %v766_v1 = vpop.xlane.xlu0 %765  ;;  %v913_v5 = vld [vmem:[#allocation3] sm:$0xff]  ;;  %778 = vst.msk [vmem:[#allocation5 + $0x10] sm:$0xff] %vm767_vm0, %v2052_v4  ;;  %779 = vst.msk [vmem:[#allocation5 + $0x18] sm:$0xff] %vm767_vm0, %v2052_v4 }
 0x217   : > { %771 = vst.msk [vmem:[#allocation3 + $0x18] sm:$0xff] %vm767_vm0, %v766_v1  ;;  %947 = vperm.xlu1 %1734, %v913_v5   ;;  %v924_v24 = vpop.permute.xlu1 %923  ;;  %780 = vst.msk [vmem:[#allocation6] sm:$0xff] %vm767_vm0, %v2052_v4  ;;  %v2629_v1 = vld [vmem:[#allocation4] sm:$0xff] }
 0x218   : > { %781 = vst.msk [vmem:[#allocation6 + $0x8] sm:$0xff] %vm767_vm0, %v2052_v4  ;;  %782 = vst.msk [vmem:[#allocation6 + $0x10] sm:$0xff] %vm767_vm0, %v2052_v4 }
 0x219   : > { %783 = vst.msk [vmem:[#allocation6 + $0x18] sm:$0xff] %vm767_vm0, %v2052_v4 }
 0x21a   : > { %v915_v8 = vld [vmem:[#allocation3 + $0x10] sm:$0xff]  ;;  %643 = vst.msk [vmem:[%s2662_s24] sm:$0x1] %vm642_vm1, %v2052_v4 }
 0x21b   : > { %v914_v6 = vld [vmem:[#allocation3 + $0x8] sm:$0xff]  ;;  %991 = vperm.xlu1 %1734, %v972_v3   ;;  %v934_v25 = vpop.permute.xlu1 %933 }
 0x21c   : > { %952 = vperm.xlu0 %1733, %v914_v6  }
 0x21e   : > { %v916_v10 = vld [vmem:[#allocation3 + $0x18] sm:$0xff]  ;;  %v929_v28 = vpop.permute.xlu0 %928 }
 0x21f   : > { %1023 = vperm.xlu1 %1734, %v1013_v7   ;;  %v977_v26 = vpop.permute.xlu1 %976  ;;  %v2639_v7 = vld [vmem:[#allocation4 + $0x8] sm:$0xff] }
 0x220   : > { %957 = vperm.xlu0 %1733, %v915_v8   ;;  %v1000_v35 = vmul.f32 %v1486_v32, %v977_v26 }
 0x222   : > { %v982_v30 = vpop.permute.xlu0 %981 }
 0x223   : > { %1033 = vperm.xlu1 %1734, %v1015_v9   ;;  %v939_v29 = vpop.permute.xlu1 %938  ;;  %v1001_v43 = vmul.f32 %v1486_v32, %v982_v30 }
 0x224   : > { %962 = vperm.xlu0 %1733, %v916_v10  }
 0x226   : > { %v1019_v36 = vpop.permute.xlu0 %1018 }
 0x227   : > { %v987_v31 = vpop.permute.xlu1 %986 }
 0x228   : > { %1028 = vperm.xlu0 %1733, %v1014_v27   ;;  %v1002_v49 = vmul.f32 %v1486_v32, %v987_v31  ;;  %v1042_v27 = vld [vmem:[#allocation4 + $0x10] sm:$0xff] }
 0x251   : > { %v1524_v12 = vpop.f32.mrb[0].mxu0 }
 0x252   : > { %v1525_v13 = vpop.f32.mrb[1].mxu0 }
 0x253   : > { %v1526_v14 = vadd.f32 %v1525_v13, %v1524_v12  ;;  %v2649_v13 = vld [vmem:[#allocation4 + $0x18] sm:$0xff] }
 0x255   : > { %v1527_v15 = vpop.f32.mrb[2].mxu0  ;;  %v1530_v16 = vpop.f32.mrb[0].mxu1  ;;  %v941_v33 = vmul.f32 %v1526_v14, %v924_v24 }
 0x256   : > { %v1528_v17 = vpop.f32.mrb[3].mxu0  ;;  %v1531_v18 = vpop.f32.mrb[1].mxu1 }
 0x257   : > { %v1529_v19 = vadd.f32 %v1528_v17, %v1527_v15  ;;  %v1532_v20 = vadd.f32 %v1531_v18, %v1530_v16 }
 0x259   : > { %v1533_v21 = vpop.f32.mrb[2].mxu1  ;;  %v942_v39 = vmul.f32 %v1529_v19, %v929_v28  ;;  %v943_v47 = vmul.f32 %v1532_v20, %v934_v25 }
 0x25a   : > { %v1534_v22 = vpop.f32.mrb[3].mxu1 }
 0x25b   : > { %v1535_v23 = vadd.f32 %v1534_v22, %v1533_v21 }
 0x25d   : > { %v944_v55 = vmul.f32 %v1535_v23, %v939_v29 }
 0x296   : > { %v948_v34 = vpop.permute.xlu1 %947 }
 0x297   : > { %v965_v37 = vsub.f32 %v948_v34, %v941_v33  ;;  %v1487_v34 = vld [vmem:[%s2498_s28] ss:$0 sm:$0xff] }
 0x299   : > { %v1004_v38 = vadd.f32 %v1000_v35, %v965_v37 }
 0x29a   : > { %v992_v41 = vpop.permute.xlu1 %991 }
 0x29b   : > { %v1008_v40 = vsub.f32 0.0, %v1004_v38  ;;  %v953_v42 = vpop.permute.xlu0 %952  ;;  %v1003_v57 = vmul.f32 %v1486_v32, %v992_v41 }
 0x29c   : > { %v966_v44 = vsub.f32 %v953_v42, %v942_v39 }
 0x29d   : > { %v2615_v45 = vmul.f32 %v1019_v36, %v1008_v40 }
 0x29e   : > { %v1005_v46 = vadd.f32 %v1001_v43, %v966_v44  ;;  %v1024_v52 = vpop.permute.xlu1 %1023 }
 0x29f   : > { %v958_v48 = vpop.permute.xlu0 %957  ;;  %1044 = vmax.xlane.f32.xlu0 %v2615_v45 }
 0x2a0   : > { %v1009_v50 = vsub.f32 0.0, %v1005_v46  ;;  %v967_v51 = vsub.f32 %v958_v48, %v943_v47  ;;  %v1100_v48 = vld [vmem:[#allocation5] sm:$0xff] }
 0x2a2   : > { %v2618_v53 = vmul.f32 %v1024_v52, %v1009_v50  ;;  %v1006_v54 = vadd.f32 %v1002_v49, %v967_v51  ;;  %v1034_v2 = vpop.permute.xlu1 %1033 }
 0x2a3   : > { %v963_v56 = vpop.permute.xlu0 %962 }
 0x2a4   : > { %v968_v58 = vsub.f32 %v963_v56, %v944_v55  ;;  %1046 = vmax.xlane.f32.xlu1 %v2618_v53  ;;  %v1010_v60 = vsub.f32 0.0, %v1006_v54  ;;  %v1101_v54 = vld [vmem:[#allocation5 + $0x8] sm:$0xff] }
 0x2a6   : > { %v1007_v59 = vadd.f32 %v1003_v57, %v968_v58  ;;  %v1129_v58 = vld [vmem:[#allocation6] sm:$0xff] }
 0x2a7   : > { %v1029_v61 = vpop.permute.xlu0 %1028 }
 0x2a8   : > { %v1011_v62 = vsub.f32 0.0, %v1007_v59  ;;  %v1038_v63 = vmul.f32 %v1029_v61, %v1010_v60  ;;  %v1102_v61 = vld [vmem:[#allocation5 + $0x10] sm:$0xff] }
 0x2aa   : > { %1048 = vmax.xlane.f32.xlu0 %v1038_v63  ;;  %v1039_v0 = vmul.f32 %v1034_v2, %v1011_v62 }
 0x2ae   : > { %1050 = vmax.xlane.f32.xlu0 %v1039_v0 }
 0x32c   : > { %v1045_v5 = vpop.xlane.xlu0 %1044 }
 0x32d   : > { %v2632_v3 = vmax.f32 %v2629_v1, %v1045_v5 }
 0x32f   : > { %v1056_v6 = vsub.f32 %v2629_v1, %v2632_v3  ;;  %1168 = vst.msk [vmem:[#allocation4] sm:$0xff] %vm767_vm0, %v2632_v3  ;;  %1070 = vperm.xlu1 %1734, %v2632_v3  }
 0x331   : > { %v1047_v8 = vpop.xlane.xlu1 %1046  ;;  %v1060_v44 = vmul.f32 1.442695, %v1056_v6  ;;  %v1131_v6 = vld [vmem:[#allocation6 + $0x10] sm:$0xff] }
 0x332   : > { %v2642_v9 = vmax.f32 %v2639_v7, %v1047_v8 }
 0x334   : > { %v1057_v10 = vsub.f32 %v2639_v7, %v2642_v9  ;;  %1169 = vst.msk [vmem:[#allocation4 + $0x8] sm:$0xff] %vm767_vm0, %v2642_v9  ;;  %1075 = vperm.xlu0 %1733, %v2642_v9   ;;  %v1103_v7 = vld [vmem:[#allocation5 + $0x18] sm:$0xff] }
 0x337   : > { %v1049_v11 = vpop.xlane.xlu0 %1048 }
 0x338   : > { %v1054_v12 = vmax.f32 %v1042_v27, %v1049_v11 }
 0x33a   : > { %v1058_v14 = vsub.f32 %v1042_v27, %v1054_v12  ;;  %1170 = vst.msk [vmem:[#allocation4 + $0x10] sm:$0xff] %vm767_vm0, %v1054_v12  ;;  %1080 = vperm.xlu1 %1734, %v1054_v12  }
 0x33b   : > { %v1051_v15 = vpop.xlane.xlu0 %1050 }
 0x33c   : > { %v1055_v16 = vmax.f32 %v2649_v13, %v1051_v15  ;;  %v1064_v46 = vmul.f32 1.442695, %v1058_v14  ;;  %v1130_v14 = vld [vmem:[#allocation6 + $0x8] sm:$0xff] }
 0x33e   : > { %v1059_v17 = vsub.f32 %v2649_v13, %v1055_v16  ;;  %1171 = vst.msk [vmem:[#allocation4 + $0x18] sm:$0xff] %vm767_vm0, %v1055_v16  ;;  %1085 = vperm.xlu1 %1734, %v1055_v16  }
 0x340   : > { %v1066_v49 = vmul.f32 1.442695, %v1059_v17 }
 0x3ae   : > { %v1071_v18 = vpop.permute.xlu1 %1070 }
 0x3af   : > { %v1088_v19 = vsub.f32 %v2615_v45, %v1071_v18  ;;  %v1062_v45 = vmul.f32 1.442695, %v1057_v10 }
 0x3b1   : > { %v1092_v20 = vmul.f32 1.442695, %v1088_v19 }
 0x3b3   : > { %1735 = vpow2.f32 %v1092_v20  ;;  %v1076_v21 = vpop.permute.xlu0 %1075  ;;  %v1132_v20 = vld [vmem:[#allocation6 + $0x18] sm:$0xff] }
 0x3b4   : > { %v1089_v22 = vsub.f32 %v2618_v53, %v1076_v21 }
 0x3b6   : > { %v1094_v23 = vmul.f32 1.442695, %v1089_v22 }
 0x3b8   : > { %1737 = vpow2.f32 %v1094_v23 }
 0x3b9   : > { %v1081_v24 = vpop.permute.xlu1 %1080 }
 0x3ba   : > { %v1090_v25 = vsub.f32 %v1038_v63, %v1081_v24 }
 0x3bc   : > { %v1096_v26 = vmul.f32 1.442695, %v1090_v25 }
 0x3bd   : > { %v1736_v28 = vpop.eup %1735  ;;  %v1086_v29 = vpop.permute.xlu1 %1085 }
 0x3be   : > { %1739 = vpow2.f32 %v1096_v26  ;;  %v1091_v30 = vsub.f32 %v1039_v0, %v1086_v29  ;;  %1108 = vadd.xlane.f32.xlu0 %v1736_v28  ;;  %v1137_v32 = vmul.f32 %v1736_v28, %v1736_v28 }
 0x3c0   : > { %v1098_v31 = vmul.f32 1.442695, %v1091_v30  ;;  %v1148_v35 = vmul.f32 %v1487_v34, %v1137_v32 }
 0x3c2   : > { %v1738_v33 = vpop.eup %1737  ;;  %1741 = vpow2.f32 %v1098_v31 }
 0x3c3   : > { %1110 = vadd.xlane.f32.xlu1 %v1738_v33  ;;  %v1138_v39 = vmul.f32 %v1738_v33, %v1738_v33  ;;  %1743 = vpow2.f32 %v1060_v44 }
 0x3c4   : > { %1745 = vpow2.f32 %v1062_v45 }
 0x3c5   : > { %v1149_v41 = vmul.f32 %v1487_v34, %v1138_v39  ;;  %1747 = vpow2.f32 %v1064_v46 }
 0x3c6   : > { %1749 = vpow2.f32 %v1066_v49  ;;  %v1199_v49 = vld [vmem:[%s2851_s7 + $0x18] sm:$0xff] }
 0x3c7   : > { %1152 = vadd.xlane.f32.xlu1 %v1148_v35 }
 0x3c8   : > { %v1740_v36 = vpop.eup %1739 }
 0x3c9   : > { %1112 = vadd.xlane.f32.xlu0 %v1740_v36  ;;  %v1139_v37 = vmul.f32 %v1740_v36, %v1740_v36 }
 0x3cb   : > { %v1150_v38 = vmul.f32 %v1487_v34, %v1139_v37 }
 0x3cc   : > { %v1742_v40 = vpop.eup %1741 }
 0x3cd   : > { %1114 = vadd.xlane.f32.xlu0 %v1742_v40  ;;  %1156 = vadd.xlane.f32.xlu1 %v1150_v38  ;;  %v1140_v42 = vmul.f32 %v1742_v40, %v1742_v40  ;;  %v1744_v47 = vpop.eup %1743  ;;  %v1196_v38 = vld [vmem:[%s2851_s7] sm:$0xff] }
 0x3ce   : > { %v1104_v50 = vmul.f32 %v1744_v47, %v1100_v48  ;;  %v1746_v52 = vpop.eup %1745  ;;  %v1125_v56 = vmul.f32 %v1744_v47, %v1744_v47 }
 0x3cf   : > { %v1151_v43 = vmul.f32 %v1487_v34, %v1140_v42  ;;  %v1105_v55 = vmul.f32 %v1746_v52, %v1101_v54  ;;  %v1748_v60 = vpop.eup %1747  ;;  %v1126_v27 = vmul.f32 %v1746_v52, %v1746_v52  ;;  %v1197_v34 = vld [vmem:[%s2851_s7 + $0x8] sm:$0xff] }
 0x3d0   : > { %v1133_v62 = vmul.f32 %v1129_v58, %v1125_v56  ;;  %v1106_v0 = vmul.f32 %v1748_v60, %v1102_v61  ;;  %v1127_v4 = vmul.f32 %v1748_v60, %v1748_v60  ;;  %v1750_v1 = vpop.eup %1749 }
 0x3d1   : > { %1154 = vadd.xlane.f32.xlu0 %v1149_v41  ;;  %v1107_v10 = vmul.f32 %v1750_v1, %v1103_v7  ;;  %v1134_v17 = vmul.f32 %v1130_v14, %v1126_v27  ;;  %v1128_v18 = vmul.f32 %v1750_v1, %v1750_v1  ;;  %v1198_v41 = vld [vmem:[%s2851_s7 + $0x10] sm:$0xff] }
 0x3d2   : > { %v1135_v9 = vmul.f32 %v1131_v6, %v1127_v4 }
 0x3d3   : > { %v1136_v23 = vmul.f32 %v1132_v20, %v1128_v18 }
 0x3d5   : > { %1158 = vadd.xlane.f32.xlu0 %v1151_v43 }
 0x44b   : > { %v1109_v51 = vpop.xlane.xlu0 %1108 }
 0x44c   : > { %v1116_v53 = vadd.f32 %v1109_v51, %v1104_v50 }
 0x44e   : > { %1121 = vst.msk [vmem:[#allocation5] sm:$0xff] %vm767_vm0, %v1116_v53 }
 0x450   : > { %v1111_v57 = vpop.xlane.xlu1 %1110 }
 0x451   : > { %v1117_v59 = vadd.f32 %v1111_v57, %v1105_v55 }
 0x453   : > { %1122 = vst.msk [vmem:[#allocation5 + $0x8] sm:$0xff] %vm767_vm0, %v1117_v59 }
 0x454   : > { %v1153_v63 = vpop.xlane.xlu1 %1152 }
 0x455   : > { %v1160_v2 = vadd.f32 %v1153_v63, %v1133_v62  ;;  %v1175_v5 = vld [vmem:[#allocation5] sm:$0xff] }
 0x456   : > { %v1113_v3 = vpop.xlane.xlu0 %1112  ;;  %1751 = vrcp.f32 %v1175_v5 }
 0x457   : > { %1164 = vst.msk [vmem:[#allocation6] sm:$0xff] %vm767_vm0, %v1160_v2  ;;  %v1118_v8 = vadd.f32 %v1113_v3, %v1106_v0  ;;  %v1195_v2 = vld [vmem:[%s2662_s24] sm:$0x1] }
 0x459   : > { %1123 = vst.msk [vmem:[#allocation5 + $0x10] sm:$0xff] %vm767_vm0, %v1118_v8 }
 0x45a   : > { %v1176_v11 = vld [vmem:[#allocation5 + $0x8] sm:$0xff]  ;;  %v1157_v12 = vpop.xlane.xlu1 %1156  ;;  %v1115_v13 = vpop.xlane.xlu0 %1114 }
 0x45b   : > { %1753 = vrcp.f32 %v1176_v11  ;;  %v1162_v15 = vadd.f32 %v1157_v12, %v1135_v9  ;;  %v1119_v16 = vadd.f32 %v1115_v13, %v1107_v10 }
 0x45d   : > { %1166 = vst.msk [vmem:[#allocation6 + $0x10] sm:$0xff] %vm767_vm0, %v1162_v15  ;;  %1124 = vst.msk [vmem:[#allocation5 + $0x18] sm:$0xff] %vm767_vm0, %v1119_v16 }
 0x45e   : > { %v1155_v19 = vpop.xlane.xlu0 %1154  ;;  %v1183_v33 = vld [vmem:[#allocation6] sm:$0xff] }
 0x45f   : > { %v1161_v21 = vadd.f32 %v1155_v19, %v1134_v17 }
 0x460   : > { %v1177_v22 = vld [vmem:[#allocation5 + $0x10] sm:$0xff]  ;;  %v1752_v25 = vpop.eup %1751 }
 0x461   : > { %1755 = vrcp.f32 %v1177_v22  ;;  %1165 = vst.msk [vmem:[#allocation6 + $0x8] sm:$0xff] %vm767_vm0, %v1161_v21  ;;  %v1187_v30 = vmul.f32 %v1752_v25, %v1752_v25 }
 0x462   : > { %v1159_v24 = vpop.xlane.xlu0 %1158 }
 0x463   : > { %v1163_v26 = vadd.f32 %v1159_v24, %v1136_v23  ;;  %v1191_v36 = vmul.f32 %v1187_v30, %v1183_v33 }
 0x464   : > { %v1178_v28 = vld [vmem:[#allocation5 + $0x18] sm:$0xff]  ;;  %v1185_v42 = vld [vmem:[#allocation6 + $0x10] sm:$0xff] }
 0x465   : > { %v1754_v29 = vpop.eup %1753  ;;  %1757 = vrcp.f32 %v1178_v28  ;;  %1167 = vst.msk [vmem:[#allocation6 + $0x18] sm:$0xff] %vm767_vm0, %v1163_v26  ;;  %v1200_v43 = vmul.f32 %v1196_v38, %v1191_v36 }
 0x466   : > { %v1188_v31 = vmul.f32 %v1754_v29, %v1754_v29 }
 0x467   : > { %v1204_v51 = vsel %vm767_vm0, %v1200_v43, 0.0 }
 0x468   : > { %v1184_v32 = vld [vmem:[#allocation6 + $0x8] sm:$0xff] }
 0x469   : > { %v1192_v35 = vmul.f32 %v1188_v31, %v1184_v32 }
 0x46b   : > { %v1756_v37 = vpop.eup %1755  ;;  %v1201_v40 = vmul.f32 %v1197_v34, %v1192_v35 }
 0x46c   : > { %v1189_v39 = vmul.f32 %v1756_v37, %v1756_v37  ;;  %v1186_v50 = vld [vmem:[#allocation6 + $0x18] sm:$0xff] }
 0x46d   : > { %v1205_v47 = vsel %vm767_vm0, %v1201_v40, 0.0 }
 0x46e   : > { %v1193_v44 = vmul.f32 %v1189_v39, %v1185_v42  ;;  %v1206_v54 = vadd.f32 %v1205_v47, %v1204_v51 }
 0x46f   : > { %v1758_v45 = vpop.eup %1757 }
 0x470   : > { %v1202_v46 = vmul.f32 %v1198_v41, %v1193_v44  ;;  %v1190_v48 = vmul.f32 %v1758_v45, %v1758_v45 }
 0x472   : > { %v1207_v52 = vsel %vm767_vm0, %v1202_v46, 0.0  ;;  %v1194_v53 = vmul.f32 %v1190_v48, %v1186_v50 }
 0x473   : > { %v1208_v56 = vadd.f32 %v1207_v52, %v1206_v54 }
 0x474   : > { %v1203_v55 = vmul.f32 %v1199_v49, %v1194_v53 }
 0x476   : > { %v1209_v57 = vsel %vm767_vm0, %v1203_v55, 0.0 }
 0x477   : > { %v1210_v58 = vadd.f32 %v1209_v57, %v1208_v56 }
 0x479   : > { %v1211_v59 = vrot.slane %v1210_v58, 4 }
 0x47b   : > { %v1212_v60 = vadd.f32 %v1211_v59, %v1210_v58 }
 0x47d   : > { %v1213_v61 = vrot.slane %v1212_v60, 2 }
 0x47f   : > { %v1214_v62 = vadd.f32 %v1213_v61, %v1212_v60 }
 0x481   : > { %v1215_v63 = vrot.slane %v1214_v62, 1 }
 0x483   : > { %v1216_v0 = vadd.f32 %v1215_v63, %v1214_v62 }
 0x485   : > { %v1217_v4 = vadd.f32 %v1216_v0, %v1195_v2 }
 0x487   : > { %1219 = vst.msk [vmem:[%s2662_s24] sm:$0x1] %vm642_vm1, %v1217_v4 }
 0x488 PF: > { %s28_s22 = sadd.s32 1, %s2039_s22   ;;  %s2853_s30 = sld [smem:[#allocation20_spill]] }
 0x489   : > { %p2700_p3 = scmp.ge.s32.totalorder %s28_s22, 22   ;;  %s2854_s10 = sld [smem:[#allocation21_spill]] }
 0x48a   : > { %s2855_s12 = sld [smem:[#allocation30_spill]]  ;;  %s2856_s23 = sld [smem:[#allocation22_spill]] }
 0x48b   : > { %s2857_s15 = sld [smem:[#allocation23_spill]]  ;;  %s2858_s27 = smov %s2360_s11 }
 0x48c   : > { %s2859_s3 = sld [smem:[#allocation27_spill]]  ;;  %s2860_s26 = sld [smem:[#allocation31_spill]] }
 0x48d   : > { %s2864_s13 = smov %s2007_s14  ;;  %s2865_s14 = smov %s2365_s5 }
 0x48e   : > { %s2866_s16 = smov %s2019_s17  ;;  %s2867_s17 = smov %s2858_s27 }
 0x48f   : > { %s2868_s18 = smov %s2031_s20  ;;  %s2869_s19 = smov %s2035_s21 }
 0x490   : > { %s2862_s11 = smov %s2855_s12  ;;  %s2863_s12 = smov %s2856_s23 }
 0x491   :  { %27 = sbr.rel (!%p2700_p3) target bundleno = 20 (0x14), region = 168 }
 0x492   : > { %s2870_s20 = smov %s2859_s3  ;;  %s2871_s21 = smov %s2860_s26 }
 0x498   :  { %1245 = vsyncpa [#allocation8], 1 }
 0x499   :  { %1247 = vsyncpa [#allocation8 + $0x1], 1 }
 0x49a   :  { %1248 = vsyncpa [#allocation10], 1 }
 0x49b   :  { %1250 = vsyncpa [#allocation10 + $0x1], 1 }
 0x49c   :  { %1251 = vsyncpa [#allocation13], 1 }
 0x49d   :  { %1253 = vsyncpa [#allocation13 + $0x1], 1 }

</bundles_post_ra>
